<compile_context>
chip_gen: v7x
topology: tpu7x:2x2x1
jax: 0.10.0
libtpu: 0.0.40
codegen_flags: <defaults>
</compile_context>

<pallas_src>
import math

import jax
import jax.numpy as jnp
from jax.experimental import pallas as pl
from jax.experimental.pallas import tpu as pltpu

# ---------------- tiny synthetic config ----------------
BATCH = 2
SEQ = 8
HIDDEN = 32
NUM_HEADS = 4
HEAD_DIM = HIDDEN // NUM_HEADS
INTERMEDIATE = 64
NUM_LAYERS = 2
VOCAB = 50
MAX_POS = 16
TYPE_VOCAB = 2
PROJECTION_DIM = 32
BERT_LN_EPS = 1e-12      # BertModel LayerNorm eps
HEAD_LN_EPS = 1e-5       # nn.LayerNorm default eps (ProjectionHead)


# ---------------- in-kernel helpers ----------------
def _ln(x, g, b, eps):
    """LayerNorm over the last dim. g/b are (1, N) and broadcast over rows."""
    mu = jnp.mean(x, axis=-1, keepdims=True)
    var = jnp.mean(jnp.square(x - mu), axis=-1, keepdims=True)
    return (x - mu) * jax.lax.rsqrt(var + eps) * g + b


def _gelu(x):
    """Exact (erf) GELU, matching torch.nn.GELU() default."""
    return 0.5 * x * (1.0 + jax.lax.erf(x * (1.0 / math.sqrt(2.0))))


# ---------------- fused encoder kernel (single invocation, whole batch) ----------------
def _encoder_kernel(emb_ref, mask_ref,
                    emb_g_ref, emb_b_ref,
                    wqkv_ref, bqkv_ref, wo_ref, bo_ref, ag_ref, ab_ref,
                    w1_ref, b1_ref, w2_ref, b2_ref, fg_ref, fb_ref,
                    wp1_ref, bp1_ref, wp2_ref, bp2_ref, pg_ref, pb_ref,
                    o_ref):
    B, S, H, D, NH = BATCH, SEQ, HIDDEN, HEAD_DIM, NUM_HEADS
    scale = 1.0 / math.sqrt(D)

    x = emb_ref[...].astype(jnp.float32)                      # (B*S, H)

    # --- BERT embedding LayerNorm ---
    x = _ln(x, emb_g_ref[...], emb_b_ref[...], BERT_LN_EPS)

    # --- transformer layers (unrolled, weights indexed statically) ---
    for li in range(NUM_LAYERS):
        # fused QKV projection: one (B*S,H) x (H,3H) matmul per layer
        qkv = jnp.dot(x, wqkv_ref[li],
                      preferred_element_type=jnp.float32) + bqkv_ref[li]
        q = qkv[:, 0 * H:1 * H]
        k = qkv[:, 1 * H:2 * H]
        v = qkv[:, 2 * H:3 * H]

        # attention per (batch, head) with static sublane/lane slices
        ctx_rows = []
        for b in range(B):
            mask_b = mask_ref[b]                              # (1, S) additive key mask
            r0 = b * S
            heads = []
            for h in range(NH):
                qh = q[r0:r0 + S, h * D:(h + 1) * D]          # (S, D)
                kh = k[r0:r0 + S, h * D:(h + 1) * D]
                vh = v[r0:r0 + S, h * D:(h + 1) * D]
                s = jnp.dot(qh, kh.T,
                            preferred_element_type=jnp.float32) * scale + mask_b
                s = s - jnp.max(s, axis=-1, keepdims=True)
                p = jnp.exp(s)
                p = p * pl.reciprocal(jnp.sum(p, axis=-1, keepdims=True),
                                      approx=True)
                heads.append(jnp.dot(p, vh,
                                     preferred_element_type=jnp.float32))
            ctx_rows.append(jnp.concatenate(heads, axis=-1))  # (S, H)
        ctx = jnp.concatenate(ctx_rows, axis=0)               # (B*S, H)

        attn_out = jnp.dot(ctx, wo_ref[li],
                           preferred_element_type=jnp.float32) + bo_ref[li]
        x = _ln(attn_out + x, ag_ref[li], ab_ref[li], BERT_LN_EPS)

        # FFN: intermediate (B*S, 64) never leaves vregs/VMEM
        hmid = _gelu(jnp.dot(x, w1_ref[li],
                             preferred_element_type=jnp.float32) + b1_ref[li])
        ffn = jnp.dot(hmid, w2_ref[li],
                      preferred_element_type=jnp.float32) + b2_ref[li]
        x = _ln(ffn + x, fg_ref[li], fb_ref[li], BERT_LN_EPS)

    # --- ProjectionHead: Linear -> GELU -> Linear -> Dropout(id) -> LayerNorm ---
    p1 = _gelu(jnp.dot(x, wp1_ref[...],
                       preferred_element_type=jnp.float32) + bp1_ref[...])
    p2 = jnp.dot(p1, wp2_ref[...],
                 preferred_element_type=jnp.float32) + bp2_ref[...]
    o_ref[...] = _ln(p2, pg_ref[...], pb_ref[...], HEAD_LN_EPS).astype(o_ref.dtype)


# ---------------- deterministic parameter init (stacked / fused layout) ----------------
def init_params(key):
    keys = jax.random.split(key, 4 + NUM_LAYERS)
    params = {
        "word_emb": jax.random.normal(keys[0], (VOCAB, HIDDEN), jnp.float32) * 0.02,
        "pos_emb": jax.random.normal(keys[1], (MAX_POS, HIDDEN), jnp.float32) * 0.02,
        "type_emb": jax.random.normal(keys[2], (TYPE_VOCAB, HIDDEN), jnp.float32) * 0.02,
        "emb_ln_g": jnp.ones((1, HIDDEN), jnp.float32),
        "emb_ln_b": jnp.zeros((1, HIDDEN), jnp.float32),
    }

    wqkv, bqkv, wo, bo, w1, b1, w2, b2 = [], [], [], [], [], [], [], []
    for li in range(NUM_LAYERS):
        lk = jax.random.split(keys[4 + li], 6)
        wq = jax.random.normal(lk[0], (HIDDEN, HIDDEN), jnp.float32) * 0.02
        wk = jax.random.normal(lk[1], (HIDDEN, HIDDEN), jnp.float32) * 0.02
        wv = jax.random.normal(lk[2], (HIDDEN, HIDDEN), jnp.float32) * 0.02
        wqkv.append(jnp.concatenate([wq, wk, wv], axis=1))          # (H, 3H)
        bqkv.append(jnp.zeros((1, 3 * HIDDEN), jnp.float32))
        wo.append(jax.random.normal(lk[3], (HIDDEN, HIDDEN), jnp.float32) * 0.02)
        bo.append(jnp.zeros((1, HIDDEN), jnp.float32))
        w1.append(jax.random.normal(lk[4], (HIDDEN, INTERMEDIATE), jnp.float32) * 0.02)
        b1.append(jnp.zeros((1, INTERMEDIATE), jnp.float32))
        w2.append(jax.random.normal(lk[5], (INTERMEDIATE, HIDDEN), jnp.float32) * 0.02)
        b2.append(jnp.zeros((1, HIDDEN), jnp.float32))

    params.update({
        "wqkv": jnp.stack(wqkv), "bqkv": jnp.stack(bqkv),
        "wo": jnp.stack(wo), "bo": jnp.stack(bo),
        "attn_ln_g": jnp.ones((NUM_LAYERS, 1, HIDDEN), jnp.float32),
        "attn_ln_b": jnp.zeros((NUM_LAYERS, 1, HIDDEN), jnp.float32),
        "w1": jnp.stack(w1), "b1": jnp.stack(b1),
        "w2": jnp.stack(w2), "b2": jnp.stack(b2),
        "ffn_ln_g": jnp.ones((NUM_LAYERS, 1, HIDDEN), jnp.float32),
        "ffn_ln_b": jnp.zeros((NUM_LAYERS, 1, HIDDEN), jnp.float32),
    })

    pk = jax.random.split(keys[3], 2)
    params["wp1"] = jax.random.normal(pk[0], (HIDDEN, PROJECTION_DIM), jnp.float32) * 0.02
    params["bp1"] = jnp.zeros((1, PROJECTION_DIM), jnp.float32)
    params["wp2"] = jax.random.normal(pk[1], (PROJECTION_DIM, PROJECTION_DIM), jnp.float32) * 0.02
    params["bp2"] = jnp.zeros((1, PROJECTION_DIM), jnp.float32)
    params["p_ln_g"] = jnp.ones((1, PROJECTION_DIM), jnp.float32)
    params["p_ln_b"] = jnp.zeros((1, PROJECTION_DIM), jnp.float32)
    return params


# ---------------- forward pass ----------------
def bert_encoder_forward(params, input_ids, attention_mask):
    B, S = input_ids.shape

    # ---- BERT embeddings (table gathers are XLA glue; LN runs in the kernel) ----
    # TODO(synk): embedding-table gathers stay as jnp.take in the wrapper (no clean
    # Pallas gather worth it at these sizes); token_type_ids hardcoded to 0.
    emb = (jnp.take(params["word_emb"], input_ids, axis=0)
           + params["pos_emb"][None, :S, :]
           + params["type_emb"][0][None, None, :])                 # (B, S, H)
    emb2d = emb.reshape(B * S, HIDDEN)                              # layout plumbing in XLA

    # additive key mask, broadcast over queries/heads inside the kernel
    add_mask = ((1.0 - attention_mask.astype(jnp.float32)) * -1e9)[:, None, :]  # (B, 1, S)

    vmem_spec = pl.BlockSpec(memory_space=pltpu.MemorySpace.VMEM)   # whole array, VMEM-resident
    args = (emb2d, add_mask,
            params["emb_ln_g"], params["emb_ln_b"],
            params["wqkv"], params["bqkv"], params["wo"], params["bo"],
            params["attn_ln_g"], params["attn_ln_b"],
            params["w1"], params["b1"], params["w2"], params["b2"],
            params["ffn_ln_g"], params["ffn_ln_b"],
            params["wp1"], params["bp1"], params["wp2"], params["bp2"],
            params["p_ln_g"], params["p_ln_b"])

    out2d = pl.pallas_call(
        _encoder_kernel,
        out_shape=jax.ShapeDtypeStruct((B * S, PROJECTION_DIM), jnp.float32),
        in_specs=[vmem_spec] * len(args),
        out_specs=vmem_spec,
    )(*args)
    return out2d.reshape(B, S, PROJECTION_DIM)


if __name__ == "__main__":
    key = jax.random.PRNGKey(0)
    pkey, dkey = jax.random.split(key)
    params = init_params(pkey)

    input_ids = jax.random.randint(dkey, (BATCH, SEQ), 0, VOCAB, dtype=jnp.int32)
    attention_mask = jnp.ones((BATCH, SEQ), dtype=jnp.int32)

    fwd = jax.jit(bert_encoder_forward)
    out = fwd(params, input_ids, attention_mask)
    jax.block_until_ready(out)
    assert out.shape == (BATCH, SEQ, PROJECTION_DIM)
    assert bool(jnp.all(jnp.isfinite(out)))
    print("KERNEL_OK")
</pallas_src>

<mosaic_0001>
module attributes {stable_mosaic.version = 11 : i64} {
  func.func @_encoder_kernel(%arg0: memref<16x32xf32, #tpu.memory_space<vmem>>, %arg1: memref<2x1x8xf32, #tpu.memory_space<vmem>>, %arg2: memref<1x32xf32, #tpu.memory_space<vmem>>, %arg3: memref<1x32xf32, #tpu.memory_space<vmem>>, %arg4: memref<2x32x96xf32, #tpu.memory_space<vmem>>, %arg5: memref<2x1x96xf32, #tpu.memory_space<vmem>>, %arg6: memref<2x32x32xf32, #tpu.memory_space<vmem>>, %arg7: memref<2x1x32xf32, #tpu.memory_space<vmem>>, %arg8: memref<2x1x32xf32, #tpu.memory_space<vmem>>, %arg9: memref<2x1x32xf32, #tpu.memory_space<vmem>>, %arg10: memref<2x32x64xf32, #tpu.memory_space<vmem>>, %arg11: memref<2x1x64xf32, #tpu.memory_space<vmem>>, %arg12: memref<2x64x32xf32, #tpu.memory_space<vmem>>, %arg13: memref<2x1x32xf32, #tpu.memory_space<vmem>>, %arg14: memref<2x1x32xf32, #tpu.memory_space<vmem>>, %arg15: memref<2x1x32xf32, #tpu.memory_space<vmem>>, %arg16: memref<32x32xf32, #tpu.memory_space<vmem>>, %arg17: memref<1x32xf32, #tpu.memory_space<vmem>>, %arg18: memref<32x32xf32, #tpu.memory_space<vmem>>, %arg19: memref<1x32xf32, #tpu.memory_space<vmem>>, %arg20: memref<1x32xf32, #tpu.memory_space<vmem>>, %arg21: memref<1x32xf32, #tpu.memory_space<vmem>>, %arg22: memref<16x32xf32, #tpu.memory_space<vmem>>) attributes {dimension_semantics = [], scalar_prefetch = 0 : i64, scratch_operands = 0 : i64, tpu.core_type = #tpu.core_type<tc>} {
    %c0 = arith.constant 0 : index
    %c0_0 = arith.constant 0 : index
    %0 = vector.load %arg0[%c0, %c0_0] : memref<16x32xf32, #tpu.memory_space<vmem>>, vector<16x32xf32>
    %c0_1 = arith.constant 0 : index
    %c0_2 = arith.constant 0 : index
    %1 = vector.load %arg2[%c0_1, %c0_2] : memref<1x32xf32, #tpu.memory_space<vmem>>, vector<1x32xf32>
    %c0_3 = arith.constant 0 : index
    %c0_4 = arith.constant 0 : index
    %2 = vector.load %arg3[%c0_3, %c0_4] : memref<1x32xf32, #tpu.memory_space<vmem>>, vector<1x32xf32>
    %cst = arith.constant dense<0.000000e+00> : vector<16xf32>
    %3 = vector.multi_reduction <add>, %0, %cst [1] : vector<16x32xf32> to vector<16xf32>
    %4 = vector.shape_cast %3 : vector<16xf32> to vector<16x1xf32>
    %cst_5 = arith.constant 3.200000e+01 : f32
    %5 = vector.broadcast %cst_5 : f32 to vector<16x1xf32>
    %6 = arith.divf %4, %5 : vector<16x1xf32>
    %7 = vector.broadcast %6 : vector<16x1xf32> to vector<16x32xf32>
    %8 = arith.subf %0, %7 : vector<16x32xf32>
    %9 = arith.mulf %8, %8 : vector<16x32xf32>
    %cst_6 = arith.constant dense<0.000000e+00> : vector<16xf32>
    %10 = vector.multi_reduction <add>, %9, %cst_6 [1] : vector<16x32xf32> to vector<16xf32>
    %11 = vector.shape_cast %10 : vector<16xf32> to vector<16x1xf32>
    %cst_7 = arith.constant 3.200000e+01 : f32
    %12 = vector.broadcast %cst_7 : f32 to vector<16x1xf32>
    %13 = arith.divf %11, %12 : vector<16x1xf32>
    %14 = vector.broadcast %6 : vector<16x1xf32> to vector<16x32xf32>
    %15 = arith.subf %0, %14 : vector<16x32xf32>
    %cst_8 = arith.constant 9.99999996E-13 : f32
    %16 = vector.broadcast %cst_8 : f32 to vector<16x1xf32>
    %17 = arith.addf %13, %16 : vector<16x1xf32>
    %18 = math.rsqrt %17 : vector<16x1xf32>
    %19 = vector.broadcast %18 : vector<16x1xf32> to vector<16x32xf32>
    %20 = arith.mulf %15, %19 : vector<16x32xf32>
    %21 = vector.broadcast %1 : vector<1x32xf32> to vector<16x32xf32>
    %22 = arith.mulf %20, %21 : vector<16x32xf32>
    %23 = vector.broadcast %2 : vector<1x32xf32> to vector<16x32xf32>
    %24 = arith.addf %22, %23 : vector<16x32xf32>
    %c0_9 = arith.constant 0 : index
    %c0_10 = arith.constant 0 : index
    %c0_11 = arith.constant 0 : index
    %25 = vector.load %arg4[%c0_9, %c0_10, %c0_11] : memref<2x32x96xf32, #tpu.memory_space<vmem>>, vector<1x32x96xf32>
    %26 = vector.shape_cast %25 : vector<1x32x96xf32> to vector<32x96xf32>
    %cst_12 = arith.constant dense<0.000000e+00> : vector<16x96xf32>
    %27 = tpu.matmul %24, %26, %cst_12 {dimension_numbers = #tpu.dot_dimension_numbers<[1], [0], [0], [1], [0, 0, 1, 1], [], []>} : vector<16x32xf32>, vector<32x96xf32>, vector<16x96xf32> -> vector<16x96xf32>
    %c0_13 = arith.constant 0 : index
    %c0_14 = arith.constant 0 : index
    %c0_15 = arith.constant 0 : index
    %28 = vector.load %arg5[%c0_13, %c0_14, %c0_15] : memref<2x1x96xf32, #tpu.memory_space<vmem>>, vector<1x1x96xf32>
    %29 = vector.shape_cast %28 : vector<1x1x96xf32> to vector<1x96xf32>
    %30 = vector.broadcast %29 : vector<1x96xf32> to vector<16x96xf32>
    %31 = arith.addf %27, %30 : vector<16x96xf32>
    %32 = vector.extract_strided_slice %31 {offsets = [0, 0], sizes = [16, 32], strides = [1, 1]} : vector<16x96xf32> to vector<16x32xf32>
    %33 = vector.extract_strided_slice %31 {offsets = [0, 32], sizes = [16, 32], strides = [1, 1]} : vector<16x96xf32> to vector<16x32xf32>
    %34 = vector.extract_strided_slice %31 {offsets = [0, 64], sizes = [16, 32], strides = [1, 1]} : vector<16x96xf32> to vector<16x32xf32>
    %c0_16 = arith.constant 0 : index
    %c0_17 = arith.constant 0 : index
    %c0_18 = arith.constant 0 : index
    %35 = vector.load %arg1[%c0_16, %c0_17, %c0_18] : memref<2x1x8xf32, #tpu.memory_space<vmem>>, vector<1x1x8xf32>
    %36 = vector.shape_cast %35 : vector<1x1x8xf32> to vector<1x8xf32>
    %37 = vector.extract_strided_slice %32 {offsets = [0, 0], sizes = [8, 8], strides = [1, 1]} : vector<16x32xf32> to vector<8x8xf32>
    %38 = vector.extract_strided_slice %33 {offsets = [0, 0], sizes = [8, 8], strides = [1, 1]} : vector<16x32xf32> to vector<8x8xf32>
    %39 = vector.extract_strided_slice %34 {offsets = [0, 0], sizes = [8, 8], strides = [1, 1]} : vector<16x32xf32> to vector<8x8xf32>
    %40 = tpu.transpose %38, [1, 0] : vector<8x8xf32> -> vector<8x8xf32>
    %cst_19 = arith.constant dense<0.000000e+00> : vector<8x8xf32>
    %41 = tpu.matmul %37, %40, %cst_19 {dimension_numbers = #tpu.dot_dimension_numbers<[1], [0], [0], [1], [0, 0, 1, 1], [], []>} : vector<8x8xf32>, vector<8x8xf32>, vector<8x8xf32> -> vector<8x8xf32>
    %cst_20 = arith.constant 0.353553385 : f32
    %42 = vector.broadcast %cst_20 : f32 to vector<8x8xf32>
    %43 = arith.mulf %41, %42 : vector<8x8xf32>
    %44 = vector.broadcast %36 : vector<1x8xf32> to vector<8x8xf32>
    %45 = arith.addf %43, %44 : vector<8x8xf32>
    %cst_21 = arith.constant dense<0xFF800000> : vector<8xf32>
    %46 = vector.multi_reduction <maximumf>, %45, %cst_21 [1] : vector<8x8xf32> to vector<8xf32>
    %47 = vector.shape_cast %46 : vector<8xf32> to vector<8x1xf32>
    %48 = vector.broadcast %47 : vector<8x1xf32> to vector<8x8xf32>
    %49 = arith.subf %45, %48 : vector<8x8xf32>
    %50 = math.exp %49 : vector<8x8xf32>
    %cst_22 = arith.constant dense<0.000000e+00> : vector<8xf32>
    %51 = vector.multi_reduction <add>, %50, %cst_22 [1] : vector<8x8xf32> to vector<8xf32>
    %52 = vector.shape_cast %51 : vector<8xf32> to vector<8x1xf32>
    %53 = tpu.reciprocal %52 {approx = true} : vector<8x1xf32> -> vector<8x1xf32>
    %54 = vector.broadcast %53 : vector<8x1xf32> to vector<8x8xf32>
    %55 = arith.mulf %50, %54 : vector<8x8xf32>
    %cst_23 = arith.constant dense<0.000000e+00> : vector<8x8xf32>
    %56 = tpu.matmul %55, %39, %cst_23 {dimension_numbers = #tpu.dot_dimension_numbers<[1], [0], [0], [1], [0, 0, 1, 1], [], []>} : vector<8x8xf32>, vector<8x8xf32>, vector<8x8xf32> -> vector<8x8xf32>
    %57 = vector.extract_strided_slice %32 {offsets = [0, 8], sizes = [8, 8], strides = [1, 1]} : vector<16x32xf32> to vector<8x8xf32>
    %58 = vector.extract_strided_slice %33 {offsets = [0, 8], sizes = [8, 8], strides = [1, 1]} : vector<16x32xf32> to vector<8x8xf32>
    %59 = vector.extract_strided_slice %34 {offsets = [0, 8], sizes = [8, 8], strides = [1, 1]} : vector<16x32xf32> to vector<8x8xf32>
    %60 = tpu.transpose %58, [1, 0] : vector<8x8xf32> -> vector<8x8xf32>
    %cst_24 = arith.constant dense<0.000000e+00> : vector<8x8xf32>
    %61 = tpu.matmul %57, %60, %cst_24 {dimension_numbers = #tpu.dot_dimension_numbers<[1], [0], [0], [1], [0, 0, 1, 1], [], []>} : vector<8x8xf32>, vector<8x8xf32>, vector<8x8xf32> -> vector<8x8xf32>
    %cst_25 = arith.constant 0.353553385 : f32
    %62 = vector.broadcast %cst_25 : f32 to vector<8x8xf32>
    %63 = arith.mulf %61, %62 : vector<8x8xf32>
    %64 = vector.broadcast %36 : vector<1x8xf32> to vector<8x8xf32>
    %65 = arith.addf %63, %64 : vector<8x8xf32>
    %cst_26 = arith.constant dense<0xFF800000> : vector<8xf32>
    %66 = vector.multi_reduction <maximumf>, %65, %cst_26 [1] : vector<8x8xf32> to vector<8xf32>
    %67 = vector.shape_cast %66 : vector<8xf32> to vector<8x1xf32>
    %68 = vector.broadcast %67 : vector<8x1xf32> to vector<8x8xf32>
    %69 = arith.subf %65, %68 : vector<8x8xf32>
    %70 = math.exp %69 : vector<8x8xf32>
    %cst_27 = arith.constant dense<0.000000e+00> : vector<8xf32>
    %71 = vector.multi_reduction <add>, %70, %cst_27 [1] : vector<8x8xf32> to vector<8xf32>
    %72 = vector.shape_cast %71 : vector<8xf32> to vector<8x1xf32>
    %73 = tpu.reciprocal %72 {approx = true} : vector<8x1xf32> -> vector<8x1xf32>
    %74 = vector.broadcast %73 : vector<8x1xf32> to vector<8x8xf32>
    %75 = arith.mulf %70, %74 : vector<8x8xf32>
    %cst_28 = arith.constant dense<0.000000e+00> : vector<8x8xf32>
    %76 = tpu.matmul %75, %59, %cst_28 {dimension_numbers = #tpu.dot_dimension_numbers<[1], [0], [0], [1], [0, 0, 1, 1], [], []>} : vector<8x8xf32>, vector<8x8xf32>, vector<8x8xf32> -> vector<8x8xf32>
    %77 = vector.extract_strided_slice %32 {offsets = [0, 16], sizes = [8, 8], strides = [1, 1]} : vector<16x32xf32> to vector<8x8xf32>
    %78 = vector.extract_strided_slice %33 {offsets = [0, 16], sizes = [8, 8], strides = [1, 1]} : vector<16x32xf32> to vector<8x8xf32>
    %79 = vector.extract_strided_slice %34 {offsets = [0, 16], sizes = [8, 8], strides = [1, 1]} : vector<16x32xf32> to vector<8x8xf32>
    %80 = tpu.transpose %78, [1, 0] : vector<8x8xf32> -> vector<8x8xf32>
    %cst_29 = arith.constant dense<0.000000e+00> : vector<8x8xf32>
    %81 = tpu.matmul %77, %80, %cst_29 {dimension_numbers = #tpu.dot_dimension_numbers<[1], [0], [0], [1], [0, 0, 1, 1], [], []>} : vector<8x8xf32>, vector<8x8xf32>, vector<8x8xf32> -> vector<8x8xf32>
    %cst_30 = arith.constant 0.353553385 : f32
    %82 = vector.broadcast %cst_30 : f32 to vector<8x8xf32>
    %83 = arith.mulf %81, %82 : vector<8x8xf32>
    %84 = vector.broadcast %36 : vector<1x8xf32> to vector<8x8xf32>
    %85 = arith.addf %83, %84 : vector<8x8xf32>
    %cst_31 = arith.constant dense<0xFF800000> : vector<8xf32>
    %86 = vector.multi_reduction <maximumf>, %85, %cst_31 [1] : vector<8x8xf32> to vector<8xf32>
    %87 = vector.shape_cast %86 : vector<8xf32> to vector<8x1xf32>
    %88 = vector.broadcast %87 : vector<8x1xf32> to vector<8x8xf32>
    %89 = arith.subf %85, %88 : vector<8x8xf32>
    %90 = math.exp %89 : vector<8x8xf32>
    %cst_32 = arith.constant dense<0.000000e+00> : vector<8xf32>
    %91 = vector.multi_reduction <add>, %90, %cst_32 [1] : vector<8x8xf32> to vector<8xf32>
    %92 = vector.shape_cast %91 : vector<8xf32> to vector<8x1xf32>
    %93 = tpu.reciprocal %92 {approx = true} : vector<8x1xf32> -> vector<8x1xf32>
    %94 = vector.broadcast %93 : vector<8x1xf32> to vector<8x8xf32>
    %95 = arith.mulf %90, %94 : vector<8x8xf32>
    %cst_33 = arith.constant dense<0.000000e+00> : vector<8x8xf32>
    %96 = tpu.matmul %95, %79, %cst_33 {dimension_numbers = #tpu.dot_dimension_numbers<[1], [0], [0], [1], [0, 0, 1, 1], [], []>} : vector<8x8xf32>, vector<8x8xf32>, vector<8x8xf32> -> vector<8x8xf32>
    %97 = vector.extract_strided_slice %32 {offsets = [0, 24], sizes = [8, 8], strides = [1, 1]} : vector<16x32xf32> to vector<8x8xf32>
    %98 = vector.extract_strided_slice %33 {offsets = [0, 24], sizes = [8, 8], strides = [1, 1]} : vector<16x32xf32> to vector<8x8xf32>
    %99 = vector.extract_strided_slice %34 {offsets = [0, 24], sizes = [8, 8], strides = [1, 1]} : vector<16x32xf32> to vector<8x8xf32>
    %100 = tpu.transpose %98, [1, 0] : vector<8x8xf32> -> vector<8x8xf32>
    %cst_34 = arith.constant dense<0.000000e+00> : vector<8x8xf32>
    %101 = tpu.matmul %97, %100, %cst_34 {dimension_numbers = #tpu.dot_dimension_numbers<[1], [0], [0], [1], [0, 0, 1, 1], [], []>} : vector<8x8xf32>, vector<8x8xf32>, vector<8x8xf32> -> vector<8x8xf32>
    %cst_35 = arith.constant 0.353553385 : f32
    %102 = vector.broadcast %cst_35 : f32 to vector<8x8xf32>
    %103 = arith.mulf %101, %102 : vector<8x8xf32>
    %104 = vector.broadcast %36 : vector<1x8xf32> to vector<8x8xf32>
    %105 = arith.addf %103, %104 : vector<8x8xf32>
    %cst_36 = arith.constant dense<0xFF800000> : vector<8xf32>
    %106 = vector.multi_reduction <maximumf>, %105, %cst_36 [1] : vector<8x8xf32> to vector<8xf32>
    %107 = vector.shape_cast %106 : vector<8xf32> to vector<8x1xf32>
    %108 = vector.broadcast %107 : vector<8x1xf32> to vector<8x8xf32>
    %109 = arith.subf %105, %108 : vector<8x8xf32>
    %110 = math.exp %109 : vector<8x8xf32>
    %cst_37 = arith.constant dense<0.000000e+00> : vector<8xf32>
    %111 = vector.multi_reduction <add>, %110, %cst_37 [1] : vector<8x8xf32> to vector<8xf32>
    %112 = vector.shape_cast %111 : vector<8xf32> to vector<8x1xf32>
    %113 = tpu.reciprocal %112 {approx = true} : vector<8x1xf32> -> vector<8x1xf32>
    %114 = vector.broadcast %113 : vector<8x1xf32> to vector<8x8xf32>
    %115 = arith.mulf %110, %114 : vector<8x8xf32>
    %cst_38 = arith.constant dense<0.000000e+00> : vector<8x8xf32>
    %116 = tpu.matmul %115, %99, %cst_38 {dimension_numbers = #tpu.dot_dimension_numbers<[1], [0], [0], [1], [0, 0, 1, 1], [], []>} : vector<8x8xf32>, vector<8x8xf32>, vector<8x8xf32> -> vector<8x8xf32>
    %117 = tpu.concatenate %56, %76, %96, %116 in 1 : vector<8x8xf32>, vector<8x8xf32>, vector<8x8xf32>, vector<8x8xf32> -> vector<8x32xf32>
    %c1 = arith.constant 1 : index
    %c0_39 = arith.constant 0 : index
    %c0_40 = arith.constant 0 : index
    %118 = vector.load %arg1[%c1, %c0_39, %c0_40] : memref<2x1x8xf32, #tpu.memory_space<vmem>>, vector<1x1x8xf32>
    %119 = vector.shape_cast %118 : vector<1x1x8xf32> to vector<1x8xf32>
    %120 = vector.extract_strided_slice %32 {offsets = [8, 0], sizes = [8, 8], strides = [1, 1]} : vector<16x32xf32> to vector<8x8xf32>
    %121 = vector.extract_strided_slice %33 {offsets = [8, 0], sizes = [8, 8], strides = [1, 1]} : vector<16x32xf32> to vector<8x8xf32>
    %122 = vector.extract_strided_slice %34 {offsets = [8, 0], sizes = [8, 8], strides = [1, 1]} : vector<16x32xf32> to vector<8x8xf32>
    %123 = tpu.transpose %121, [1, 0] : vector<8x8xf32> -> vector<8x8xf32>
    %cst_41 = arith.constant dense<0.000000e+00> : vector<8x8xf32>
    %124 = tpu.matmul %120, %123, %cst_41 {dimension_numbers = #tpu.dot_dimension_numbers<[1], [0], [0], [1], [0, 0, 1, 1], [], []>} : vector<8x8xf32>, vector<8x8xf32>, vector<8x8xf32> -> vector<8x8xf32>
    %cst_42 = arith.constant 0.353553385 : f32
    %125 = vector.broadcast %cst_42 : f32 to vector<8x8xf32>
    %126 = arith.mulf %124, %125 : vector<8x8xf32>
    %127 = vector.broadcast %119 : vector<1x8xf32> to vector<8x8xf32>
    %128 = arith.addf %126, %127 : vector<8x8xf32>
    %cst_43 = arith.constant dense<0xFF800000> : vector<8xf32>
    %129 = vector.multi_reduction <maximumf>, %128, %cst_43 [1] : vector<8x8xf32> to vector<8xf32>
    %130 = vector.shape_cast %129 : vector<8xf32> to vector<8x1xf32>
    %131 = vector.broadcast %130 : vector<8x1xf32> to vector<8x8xf32>
    %132 = arith.subf %128, %131 : vector<8x8xf32>
    %133 = math.exp %132 : vector<8x8xf32>
    %cst_44 = arith.constant dense<0.000000e+00> : vector<8xf32>
    %134 = vector.multi_reduction <add>, %133, %cst_44 [1] : vector<8x8xf32> to vector<8xf32>
    %135 = vector.shape_cast %134 : vector<8xf32> to vector<8x1xf32>
    %136 = tpu.reciprocal %135 {approx = true} : vector<8x1xf32> -> vector<8x1xf32>
    %137 = vector.broadcast %136 : vector<8x1xf32> to vector<8x8xf32>
    %138 = arith.mulf %133, %137 : vector<8x8xf32>
    %cst_45 = arith.constant dense<0.000000e+00> : vector<8x8xf32>
    %139 = tpu.matmul %138, %122, %cst_45 {dimension_numbers = #tpu.dot_dimension_numbers<[1], [0], [0], [1], [0, 0, 1, 1], [], []>} : vector<8x8xf32>, vector<8x8xf32>, vector<8x8xf32> -> vector<8x8xf32>
    %140 = vector.extract_strided_slice %32 {offsets = [8, 8], sizes = [8, 8], strides = [1, 1]} : vector<16x32xf32> to vector<8x8xf32>
    %141 = vector.extract_strided_slice %33 {offsets = [8, 8], sizes = [8, 8], strides = [1, 1]} : vector<16x32xf32> to vector<8x8xf32>
    %142 = vector.extract_strided_slice %34 {offsets = [8, 8], sizes = [8, 8], strides = [1, 1]} : vector<16x32xf32> to vector<8x8xf32>
    %143 = tpu.transpose %141, [1, 0] : vector<8x8xf32> -> vector<8x8xf32>
    %cst_46 = arith.constant dense<0.000000e+00> : vector<8x8xf32>
    %144 = tpu.matmul %140, %143, %cst_46 {dimension_numbers = #tpu.dot_dimension_numbers<[1], [0], [0], [1], [0, 0, 1, 1], [], []>} : vector<8x8xf32>, vector<8x8xf32>, vector<8x8xf32> -> vector<8x8xf32>
    %cst_47 = arith.constant 0.353553385 : f32
    %145 = vector.broadcast %cst_47 : f32 to vector<8x8xf32>
    %146 = arith.mulf %144, %145 : vector<8x8xf32>
    %147 = vector.broadcast %119 : vector<1x8xf32> to vector<8x8xf32>
    %148 = arith.addf %146, %147 : vector<8x8xf32>
    %cst_48 = arith.constant dense<0xFF800000> : vector<8xf32>
    %149 = vector.multi_reduction <maximumf>, %148, %cst_48 [1] : vector<8x8xf32> to vector<8xf32>
    %150 = vector.shape_cast %149 : vector<8xf32> to vector<8x1xf32>
    %151 = vector.broadcast %150 : vector<8x1xf32> to vector<8x8xf32>
    %152 = arith.subf %148, %151 : vector<8x8xf32>
    %153 = math.exp %152 : vector<8x8xf32>
    %cst_49 = arith.constant dense<0.000000e+00> : vector<8xf32>
    %154 = vector.multi_reduction <add>, %153, %cst_49 [1] : vector<8x8xf32> to vector<8xf32>
    %155 = vector.shape_cast %154 : vector<8xf32> to vector<8x1xf32>
    %156 = tpu.reciprocal %155 {approx = true} : vector<8x1xf32> -> vector<8x1xf32>
    %157 = vector.broadcast %156 : vector<8x1xf32> to vector<8x8xf32>
    %158 = arith.mulf %153, %157 : vector<8x8xf32>
    %cst_50 = arith.constant dense<0.000000e+00> : vector<8x8xf32>
    %159 = tpu.matmul %158, %142, %cst_50 {dimension_numbers = #tpu.dot_dimension_numbers<[1], [0], [0], [1], [0, 0, 1, 1], [], []>} : vector<8x8xf32>, vector<8x8xf32>, vector<8x8xf32> -> vector<8x8xf32>
    %160 = vector.extract_strided_slice %32 {offsets = [8, 16], sizes = [8, 8], strides = [1, 1]} : vector<16x32xf32> to vector<8x8xf32>
    %161 = vector.extract_strided_slice %33 {offsets = [8, 16], sizes = [8, 8], strides = [1, 1]} : vector<16x32xf32> to vector<8x8xf32>
    %162 = vector.extract_strided_slice %34 {offsets = [8, 16], sizes = [8, 8], strides = [1, 1]} : vector<16x32xf32> to vector<8x8xf32>
    %163 = tpu.transpose %161, [1, 0] : vector<8x8xf32> -> vector<8x8xf32>
    %cst_51 = arith.constant dense<0.000000e+00> : vector<8x8xf32>
    %164 = tpu.matmul %160, %163, %cst_51 {dimension_numbers = #tpu.dot_dimension_numbers<[1], [0], [0], [1], [0, 0, 1, 1], [], []>} : vector<8x8xf32>, vector<8x8xf32>, vector<8x8xf32> -> vector<8x8xf32>
    %cst_52 = arith.constant 0.353553385 : f32
    %165 = vector.broadcast %cst_52 : f32 to vector<8x8xf32>
    %166 = arith.mulf %164, %165 : vector<8x8xf32>
    %167 = vector.broadcast %119 : vector<1x8xf32> to vector<8x8xf32>
    %168 = arith.addf %166, %167 : vector<8x8xf32>
    %cst_53 = arith.constant dense<0xFF800000> : vector<8xf32>
    %169 = vector.multi_reduction <maximumf>, %168, %cst_53 [1] : vector<8x8xf32> to vector<8xf32>
    %170 = vector.shape_cast %169 : vector<8xf32> to vector<8x1xf32>
    %171 = vector.broadcast %170 : vector<8x1xf32> to vector<8x8xf32>
    %172 = arith.subf %168, %171 : vector<8x8xf32>
    %173 = math.exp %172 : vector<8x8xf32>
    %cst_54 = arith.constant dense<0.000000e+00> : vector<8xf32>
    %174 = vector.multi_reduction <add>, %173, %cst_54 [1] : vector<8x8xf32> to vector<8xf32>
    %175 = vector.shape_cast %174 : vector<8xf32> to vector<8x1xf32>
    %176 = tpu.reciprocal %175 {approx = true} : vector<8x1xf32> -> vector<8x1xf32>
    %177 = vector.broadcast %176 : vector<8x1xf32> to vector<8x8xf32>
    %178 = arith.mulf %173, %177 : vector<8x8xf32>
    %cst_55 = arith.constant dense<0.000000e+00> : vector<8x8xf32>
    %179 = tpu.matmul %178, %162, %cst_55 {dimension_numbers = #tpu.dot_dimension_numbers<[1], [0], [0], [1], [0, 0, 1, 1], [], []>} : vector<8x8xf32>, vector<8x8xf32>, vector<8x8xf32> -> vector<8x8xf32>
    %180 = vector.extract_strided_slice %32 {offsets = [8, 24], sizes = [8, 8], strides = [1, 1]} : vector<16x32xf32> to vector<8x8xf32>
    %181 = vector.extract_strided_slice %33 {offsets = [8, 24], sizes = [8, 8], strides = [1, 1]} : vector<16x32xf32> to vector<8x8xf32>
    %182 = vector.extract_strided_slice %34 {offsets = [8, 24], sizes = [8, 8], strides = [1, 1]} : vector<16x32xf32> to vector<8x8xf32>
    %183 = tpu.transpose %181, [1, 0] : vector<8x8xf32> -> vector<8x8xf32>
    %cst_56 = arith.constant dense<0.000000e+00> : vector<8x8xf32>
    %184 = tpu.matmul %180, %183, %cst_56 {dimension_numbers = #tpu.dot_dimension_numbers<[1], [0], [0], [1], [0, 0, 1, 1], [], []>} : vector<8x8xf32>, vector<8x8xf32>, vector<8x8xf32> -> vector<8x8xf32>
    %cst_57 = arith.constant 0.353553385 : f32
    %185 = vector.broadcast %cst_57 : f32 to vector<8x8xf32>
    %186 = arith.mulf %184, %185 : vector<8x8xf32>
    %187 = vector.broadcast %119 : vector<1x8xf32> to vector<8x8xf32>
    %188 = arith.addf %186, %187 : vector<8x8xf32>
    %cst_58 = arith.constant dense<0xFF800000> : vector<8xf32>
    %189 = vector.multi_reduction <maximumf>, %188, %cst_58 [1] : vector<8x8xf32> to vector<8xf32>
    %190 = vector.shape_cast %189 : vector<8xf32> to vector<8x1xf32>
    %191 = vector.broadcast %190 : vector<8x1xf32> to vector<8x8xf32>
    %192 = arith.subf %188, %191 : vector<8x8xf32>
    %193 = math.exp %192 : vector<8x8xf32>
    %cst_59 = arith.constant dense<0.000000e+00> : vector<8xf32>
    %194 = vector.multi_reduction <add>, %193, %cst_59 [1] : vector<8x8xf32> to vector<8xf32>
    %195 = vector.shape_cast %194 : vector<8xf32> to vector<8x1xf32>
    %196 = tpu.reciprocal %195 {approx = true} : vector<8x1xf32> -> vector<8x1xf32>
    %197 = vector.broadcast %196 : vector<8x1xf32> to vector<8x8xf32>
    %198 = arith.mulf %193, %197 : vector<8x8xf32>
    %cst_60 = arith.constant dense<0.000000e+00> : vector<8x8xf32>
    %199 = tpu.matmul %198, %182, %cst_60 {dimension_numbers = #tpu.dot_dimension_numbers<[1], [0], [0], [1], [0, 0, 1, 1], [], []>} : vector<8x8xf32>, vector<8x8xf32>, vector<8x8xf32> -> vector<8x8xf32>
    %200 = tpu.concatenate %139, %159, %179, %199 in 1 : vector<8x8xf32>, vector<8x8xf32>, vector<8x8xf32>, vector<8x8xf32> -> vector<8x32xf32>
    %201 = tpu.concatenate %117, %200 in 0 : vector<8x32xf32>, vector<8x32xf32> -> vector<16x32xf32>
    %c0_61 = arith.constant 0 : index
    %c0_62 = arith.constant 0 : index
    %c0_63 = arith.constant 0 : index
    %202 = vector.load %arg6[%c0_61, %c0_62, %c0_63] : memref<2x32x32xf32, #tpu.memory_space<vmem>>, vector<1x32x32xf32>
    %203 = vector.shape_cast %202 : vector<1x32x32xf32> to vector<32x32xf32>
    %cst_64 = arith.constant dense<0.000000e+00> : vector<16x32xf32>
    %204 = tpu.matmul %201, %203, %cst_64 {dimension_numbers = #tpu.dot_dimension_numbers<[1], [0], [0], [1], [0, 0, 1, 1], [], []>} : vector<16x32xf32>, vector<32x32xf32>, vector<16x32xf32> -> vector<16x32xf32>
    %c0_65 = arith.constant 0 : index
    %c0_66 = arith.constant 0 : index
    %c0_67 = arith.constant 0 : index
    %205 = vector.load %arg7[%c0_65, %c0_66, %c0_67] : memref<2x1x32xf32, #tpu.memory_space<vmem>>, vector<1x1x32xf32>
    %206 = vector.shape_cast %205 : vector<1x1x32xf32> to vector<1x32xf32>
    %207 = vector.broadcast %206 : vector<1x32xf32> to vector<16x32xf32>
    %208 = arith.addf %204, %207 : vector<16x32xf32>
    %209 = arith.addf %208, %24 : vector<16x32xf32>
    %c0_68 = arith.constant 0 : index
    %c0_69 = arith.constant 0 : index
    %c0_70 = arith.constant 0 : index
    %210 = vector.load %arg8[%c0_68, %c0_69, %c0_70] : memref<2x1x32xf32, #tpu.memory_space<vmem>>, vector<1x1x32xf32>
    %211 = vector.shape_cast %210 : vector<1x1x32xf32> to vector<1x32xf32>
    %c0_71 = arith.constant 0 : index
    %c0_72 = arith.constant 0 : index
    %c0_73 = arith.constant 0 : index
    %212 = vector.load %arg9[%c0_71, %c0_72, %c0_73] : memref<2x1x32xf32, #tpu.memory_space<vmem>>, vector<1x1x32xf32>
    %213 = vector.shape_cast %212 : vector<1x1x32xf32> to vector<1x32xf32>
    %cst_74 = arith.constant dense<0.000000e+00> : vector<16xf32>
    %214 = vector.multi_reduction <add>, %209, %cst_74 [1] : vector<16x32xf32> to vector<16xf32>
    %215 = vector.shape_cast %214 : vector<16xf32> to vector<16x1xf32>
    %cst_75 = arith.constant 3.200000e+01 : f32
    %216 = vector.broadcast %cst_75 : f32 to vector<16x1xf32>
    %217 = arith.divf %215, %216 : vector<16x1xf32>
    %218 = vector.broadcast %217 : vector<16x1xf32> to vector<16x32xf32>
    %219 = arith.subf %209, %218 : vector<16x32xf32>
    %220 = arith.mulf %219, %219 : vector<16x32xf32>
    %cst_76 = arith.constant dense<0.000000e+00> : vector<16xf32>
    %221 = vector.multi_reduction <add>, %220, %cst_76 [1] : vector<16x32xf32> to vector<16xf32>
    %222 = vector.shape_cast %221 : vector<16xf32> to vector<16x1xf32>
    %cst_77 = arith.constant 3.200000e+01 : f32
    %223 = vector.broadcast %cst_77 : f32 to vector<16x1xf32>
    %224 = arith.divf %222, %223 : vector<16x1xf32>
    %225 = vector.broadcast %217 : vector<16x1xf32> to vector<16x32xf32>
    %226 = arith.subf %209, %225 : vector<16x32xf32>
    %cst_78 = arith.constant 9.99999996E-13 : f32
    %227 = vector.broadcast %cst_78 : f32 to vector<16x1xf32>
    %228 = arith.addf %224, %227 : vector<16x1xf32>
    %229 = math.rsqrt %228 : vector<16x1xf32>
    %230 = vector.broadcast %229 : vector<16x1xf32> to vector<16x32xf32>
    %231 = arith.mulf %226, %230 : vector<16x32xf32>
    %232 = vector.broadcast %211 : vector<1x32xf32> to vector<16x32xf32>
    %233 = arith.mulf %231, %232 : vector<16x32xf32>
    %234 = vector.broadcast %213 : vector<1x32xf32> to vector<16x32xf32>
    %235 = arith.addf %233, %234 : vector<16x32xf32>
    %c0_79 = arith.constant 0 : index
    %c0_80 = arith.constant 0 : index
    %c0_81 = arith.constant 0 : index
    %236 = vector.load %arg10[%c0_79, %c0_80, %c0_81] : memref<2x32x64xf32, #tpu.memory_space<vmem>>, vector<1x32x64xf32>
    %237 = vector.shape_cast %236 : vector<1x32x64xf32> to vector<32x64xf32>
    %cst_82 = arith.constant dense<0.000000e+00> : vector<16x64xf32>
    %238 = tpu.matmul %235, %237, %cst_82 {dimension_numbers = #tpu.dot_dimension_numbers<[1], [0], [0], [1], [0, 0, 1, 1], [], []>} : vector<16x32xf32>, vector<32x64xf32>, vector<16x64xf32> -> vector<16x64xf32>
    %c0_83 = arith.constant 0 : index
    %c0_84 = arith.constant 0 : index
    %c0_85 = arith.constant 0 : index
    %239 = vector.load %arg11[%c0_83, %c0_84, %c0_85] : memref<2x1x64xf32, #tpu.memory_space<vmem>>, vector<1x1x64xf32>
    %240 = vector.shape_cast %239 : vector<1x1x64xf32> to vector<1x64xf32>
    %241 = vector.broadcast %240 : vector<1x64xf32> to vector<16x64xf32>
    %242 = arith.addf %238, %241 : vector<16x64xf32>
    %cst_86 = arith.constant 5.000000e-01 : f32
    %243 = vector.broadcast %cst_86 : f32 to vector<16x64xf32>
    %244 = arith.mulf %243, %242 : vector<16x64xf32>
    %cst_87 = arith.constant 0.707106769 : f32
    %245 = vector.broadcast %cst_87 : f32 to vector<16x64xf32>
    %246 = arith.mulf %242, %245 : vector<16x64xf32>
    %247 = math.erf %246 : vector<16x64xf32>
    %cst_88 = arith.constant 1.000000e+00 : f32
    %248 = vector.broadcast %cst_88 : f32 to vector<16x64xf32>
    %249 = arith.addf %248, %247 : vector<16x64xf32>
    %250 = arith.mulf %244, %249 : vector<16x64xf32>
    %c0_89 = arith.constant 0 : index
    %c0_90 = arith.constant 0 : index
    %c0_91 = arith.constant 0 : index
    %251 = vector.load %arg12[%c0_89, %c0_90, %c0_91] : memref<2x64x32xf32, #tpu.memory_space<vmem>>, vector<1x64x32xf32>
    %252 = vector.shape_cast %251 : vector<1x64x32xf32> to vector<64x32xf32>
    %cst_92 = arith.constant dense<0.000000e+00> : vector<16x32xf32>
    %253 = tpu.matmul %250, %252, %cst_92 {dimension_numbers = #tpu.dot_dimension_numbers<[1], [0], [0], [1], [0, 0, 1, 1], [], []>} : vector<16x64xf32>, vector<64x32xf32>, vector<16x32xf32> -> vector<16x32xf32>
    %c0_93 = arith.constant 0 : index
    %c0_94 = arith.constant 0 : index
    %c0_95 = arith.constant 0 : index
    %254 = vector.load %arg13[%c0_93, %c0_94, %c0_95] : memref<2x1x32xf32, #tpu.memory_space<vmem>>, vector<1x1x32xf32>
    %255 = vector.shape_cast %254 : vector<1x1x32xf32> to vector<1x32xf32>
    %256 = vector.broadcast %255 : vector<1x32xf32> to vector<16x32xf32>
    %257 = arith.addf %253, %256 : vector<16x32xf32>
    %258 = arith.addf %257, %235 : vector<16x32xf32>
    %c0_96 = arith.constant 0 : index
    %c0_97 = arith.constant 0 : index
    %c0_98 = arith.constant 0 : index
    %259 = vector.load %arg14[%c0_96, %c0_97, %c0_98] : memref<2x1x32xf32, #tpu.memory_space<vmem>>, vector<1x1x32xf32>
    %260 = vector.shape_cast %259 : vector<1x1x32xf32> to vector<1x32xf32>
    %c0_99 = arith.constant 0 : index
    %c0_100 = arith.constant 0 : index
    %c0_101 = arith.constant 0 : index
    %261 = vector.load %arg15[%c0_99, %c0_100, %c0_101] : memref<2x1x32xf32, #tpu.memory_space<vmem>>, vector<1x1x32xf32>
    %262 = vector.shape_cast %261 : vector<1x1x32xf32> to vector<1x32xf32>
    %cst_102 = arith.constant dense<0.000000e+00> : vector<16xf32>
    %263 = vector.multi_reduction <add>, %258, %cst_102 [1] : vector<16x32xf32> to vector<16xf32>
    %264 = vector.shape_cast %263 : vector<16xf32> to vector<16x1xf32>
    %cst_103 = arith.constant 3.200000e+01 : f32
    %265 = vector.broadcast %cst_103 : f32 to vector<16x1xf32>
    %266 = arith.divf %264, %265 : vector<16x1xf32>
    %267 = vector.broadcast %266 : vector<16x1xf32> to vector<16x32xf32>
    %268 = arith.subf %258, %267 : vector<16x32xf32>
    %269 = arith.mulf %268, %268 : vector<16x32xf32>
    %cst_104 = arith.constant dense<0.000000e+00> : vector<16xf32>
    %270 = vector.multi_reduction <add>, %269, %cst_104 [1] : vector<16x32xf32> to vector<16xf32>
    %271 = vector.shape_cast %270 : vector<16xf32> to vector<16x1xf32>
    %cst_105 = arith.constant 3.200000e+01 : f32
    %272 = vector.broadcast %cst_105 : f32 to vector<16x1xf32>
    %273 = arith.divf %271, %272 : vector<16x1xf32>
    %274 = vector.broadcast %266 : vector<16x1xf32> to vector<16x32xf32>
    %275 = arith.subf %258, %274 : vector<16x32xf32>
    %cst_106 = arith.constant 9.99999996E-13 : f32
    %276 = vector.broadcast %cst_106 : f32 to vector<16x1xf32>
    %277 = arith.addf %273, %276 : vector<16x1xf32>
    %278 = math.rsqrt %277 : vector<16x1xf32>
    %279 = vector.broadcast %278 : vector<16x1xf32> to vector<16x32xf32>
    %280 = arith.mulf %275, %279 : vector<16x32xf32>
    %281 = vector.broadcast %260 : vector<1x32xf32> to vector<16x32xf32>
    %282 = arith.mulf %280, %281 : vector<16x32xf32>
    %283 = vector.broadcast %262 : vector<1x32xf32> to vector<16x32xf32>
    %284 = arith.addf %282, %283 : vector<16x32xf32>
    %c1_107 = arith.constant 1 : index
    %c0_108 = arith.constant 0 : index
    %c0_109 = arith.constant 0 : index
    %285 = vector.load %arg4[%c1_107, %c0_108, %c0_109] : memref<2x32x96xf32, #tpu.memory_space<vmem>>, vector<1x32x96xf32>
    %286 = vector.shape_cast %285 : vector<1x32x96xf32> to vector<32x96xf32>
    %cst_110 = arith.constant dense<0.000000e+00> : vector<16x96xf32>
    %287 = tpu.matmul %284, %286, %cst_110 {dimension_numbers = #tpu.dot_dimension_numbers<[1], [0], [0], [1], [0, 0, 1, 1], [], []>} : vector<16x32xf32>, vector<32x96xf32>, vector<16x96xf32> -> vector<16x96xf32>
    %c1_111 = arith.constant 1 : index
    %c0_112 = arith.constant 0 : index
    %c0_113 = arith.constant 0 : index
    %288 = vector.load %arg5[%c1_111, %c0_112, %c0_113] : memref<2x1x96xf32, #tpu.memory_space<vmem>>, vector<1x1x96xf32>
    %289 = vector.shape_cast %288 : vector<1x1x96xf32> to vector<1x96xf32>
    %290 = vector.broadcast %289 : vector<1x96xf32> to vector<16x96xf32>
    %291 = arith.addf %287, %290 : vector<16x96xf32>
    %292 = vector.extract_strided_slice %291 {offsets = [0, 0], sizes = [16, 32], strides = [1, 1]} : vector<16x96xf32> to vector<16x32xf32>
    %293 = vector.extract_strided_slice %291 {offsets = [0, 32], sizes = [16, 32], strides = [1, 1]} : vector<16x96xf32> to vector<16x32xf32>
    %294 = vector.extract_strided_slice %291 {offsets = [0, 64], sizes = [16, 32], strides = [1, 1]} : vector<16x96xf32> to vector<16x32xf32>
    %c0_114 = arith.constant 0 : index
    %c0_115 = arith.constant 0 : index
    %c0_116 = arith.constant 0 : index
    %295 = vector.load %arg1[%c0_114, %c0_115, %c0_116] : memref<2x1x8xf32, #tpu.memory_space<vmem>>, vector<1x1x8xf32>
    %296 = vector.shape_cast %295 : vector<1x1x8xf32> to vector<1x8xf32>
    %297 = vector.extract_strided_slice %292 {offsets = [0, 0], sizes = [8, 8], strides = [1, 1]} : vector<16x32xf32> to vector<8x8xf32>
    %298 = vector.extract_strided_slice %293 {offsets = [0, 0], sizes = [8, 8], strides = [1, 1]} : vector<16x32xf32> to vector<8x8xf32>
    %299 = vector.extract_strided_slice %294 {offsets = [0, 0], sizes = [8, 8], strides = [1, 1]} : vector<16x32xf32> to vector<8x8xf32>
    %300 = tpu.transpose %298, [1, 0] : vector<8x8xf32> -> vector<8x8xf32>
    %cst_117 = arith.constant dense<0.000000e+00> : vector<8x8xf32>
    %301 = tpu.matmul %297, %300, %cst_117 {dimension_numbers = #tpu.dot_dimension_numbers<[1], [0], [0], [1], [0, 0, 1, 1], [], []>} : vector<8x8xf32>, vector<8x8xf32>, vector<8x8xf32> -> vector<8x8xf32>
    %cst_118 = arith.constant 0.353553385 : f32
    %302 = vector.broadcast %cst_118 : f32 to vector<8x8xf32>
    %303 = arith.mulf %301, %302 : vector<8x8xf32>
    %304 = vector.broadcast %296 : vector<1x8xf32> to vector<8x8xf32>
    %305 = arith.addf %303, %304 : vector<8x8xf32>
    %cst_119 = arith.constant dense<0xFF800000> : vector<8xf32>
    %306 = vector.multi_reduction <maximumf>, %305, %cst_119 [1] : vector<8x8xf32> to vector<8xf32>
    %307 = vector.shape_cast %306 : vector<8xf32> to vector<8x1xf32>
    %308 = vector.broadcast %307 : vector<8x1xf32> to vector<8x8xf32>
    %309 = arith.subf %305, %308 : vector<8x8xf32>
    %310 = math.exp %309 : vector<8x8xf32>
    %cst_120 = arith.constant dense<0.000000e+00> : vector<8xf32>
    %311 = vector.multi_reduction <add>, %310, %cst_120 [1] : vector<8x8xf32> to vector<8xf32>
    %312 = vector.shape_cast %311 : vector<8xf32> to vector<8x1xf32>
    %313 = tpu.reciprocal %312 {approx = true} : vector<8x1xf32> -> vector<8x1xf32>
    %314 = vector.broadcast %313 : vector<8x1xf32> to vector<8x8xf32>
    %315 = arith.mulf %310, %314 : vector<8x8xf32>
    %cst_121 = arith.constant dense<0.000000e+00> : vector<8x8xf32>
    %316 = tpu.matmul %315, %299, %cst_121 {dimension_numbers = #tpu.dot_dimension_numbers<[1], [0], [0], [1], [0, 0, 1, 1], [], []>} : vector<8x8xf32>, vector<8x8xf32>, vector<8x8xf32> -> vector<8x8xf32>
    %317 = vector.extract_strided_slice %292 {offsets = [0, 8], sizes = [8, 8], strides = [1, 1]} : vector<16x32xf32> to vector<8x8xf32>
    %318 = vector.extract_strided_slice %293 {offsets = [0, 8], sizes = [8, 8], strides = [1, 1]} : vector<16x32xf32> to vector<8x8xf32>
    %319 = vector.extract_strided_slice %294 {offsets = [0, 8], sizes = [8, 8], strides = [1, 1]} : vector<16x32xf32> to vector<8x8xf32>
    %320 = tpu.transpose %318, [1, 0] : vector<8x8xf32> -> vector<8x8xf32>
    %cst_122 = arith.constant dense<0.000000e+00> : vector<8x8xf32>
    %321 = tpu.matmul %317, %320, %cst_122 {dimension_numbers = #tpu.dot_dimension_numbers<[1], [0], [0], [1], [0, 0, 1, 1], [], []>} : vector<8x8xf32>, vector<8x8xf32>, vector<8x8xf32> -> vector<8x8xf32>
    %cst_123 = arith.constant 0.353553385 : f32
    %322 = vector.broadcast %cst_123 : f32 to vector<8x8xf32>
    %323 = arith.mulf %321, %322 : vector<8x8xf32>
    %324 = vector.broadcast %296 : vector<1x8xf32> to vector<8x8xf32>
    %325 = arith.addf %323, %324 : vector<8x8xf32>
    %cst_124 = arith.constant dense<0xFF800000> : vector<8xf32>
    %326 = vector.multi_reduction <maximumf>, %325, %cst_124 [1] : vector<8x8xf32> to vector<8xf32>
    %327 = vector.shape_cast %326 : vector<8xf32> to vector<8x1xf32>
    %328 = vector.broadcast %327 : vector<8x1xf32> to vector<8x8xf32>
    %329 = arith.subf %325, %328 : vector<8x8xf32>
    %330 = math.exp %329 : vector<8x8xf32>
    %cst_125 = arith.constant dense<0.000000e+00> : vector<8xf32>
    %331 = vector.multi_reduction <add>, %330, %cst_125 [1] : vector<8x8xf32> to vector<8xf32>
    %332 = vector.shape_cast %331 : vector<8xf32> to vector<8x1xf32>
    %333 = tpu.reciprocal %332 {approx = true} : vector<8x1xf32> -> vector<8x1xf32>
    %334 = vector.broadcast %333 : vector<8x1xf32> to vector<8x8xf32>
    %335 = arith.mulf %330, %334 : vector<8x8xf32>
    %cst_126 = arith.constant dense<0.000000e+00> : vector<8x8xf32>
    %336 = tpu.matmul %335, %319, %cst_126 {dimension_numbers = #tpu.dot_dimension_numbers<[1], [0], [0], [1], [0, 0, 1, 1], [], []>} : vector<8x8xf32>, vector<8x8xf32>, vector<8x8xf32> -> vector<8x8xf32>
    %337 = vector.extract_strided_slice %292 {offsets = [0, 16], sizes = [8, 8], strides = [1, 1]} : vector<16x32xf32> to vector<8x8xf32>
    %338 = vector.extract_strided_slice %293 {offsets = [0, 16], sizes = [8, 8], strides = [1, 1]} : vector<16x32xf32> to vector<8x8xf32>
    %339 = vector.extract_strided_slice %294 {offsets = [0, 16], sizes = [8, 8], strides = [1, 1]} : vector<16x32xf32> to vector<8x8xf32>
    %340 = tpu.transpose %338, [1, 0] : vector<8x8xf32> -> vector<8x8xf32>
    %cst_127 = arith.constant dense<0.000000e+00> : vector<8x8xf32>
    %341 = tpu.matmul %337, %340, %cst_127 {dimension_numbers = #tpu.dot_dimension_numbers<[1], [0], [0], [1], [0, 0, 1, 1], [], []>} : vector<8x8xf32>, vector<8x8xf32>, vector<8x8xf32> -> vector<8x8xf32>
    %cst_128 = arith.constant 0.353553385 : f32
    %342 = vector.broadcast %cst_128 : f32 to vector<8x8xf32>
    %343 = arith.mulf %341, %342 : vector<8x8xf32>
    %344 = vector.broadcast %296 : vector<1x8xf32> to vector<8x8xf32>
    %345 = arith.addf %343, %344 : vector<8x8xf32>
    %cst_129 = arith.constant dense<0xFF800000> : vector<8xf32>
    %346 = vector.multi_reduction <maximumf>, %345, %cst_129 [1] : vector<8x8xf32> to vector<8xf32>
    %347 = vector.shape_cast %346 : vector<8xf32> to vector<8x1xf32>
    %348 = vector.broadcast %347 : vector<8x1xf32> to vector<8x8xf32>
    %349 = arith.subf %345, %348 : vector<8x8xf32>
    %350 = math.exp %349 : vector<8x8xf32>
    %cst_130 = arith.constant dense<0.000000e+00> : vector<8xf32>
    %351 = vector.multi_reduction <add>, %350, %cst_130 [1] : vector<8x8xf32> to vector<8xf32>
    %352 = vector.shape_cast %351 : vector<8xf32> to vector<8x1xf32>
    %353 = tpu.reciprocal %352 {approx = true} : vector<8x1xf32> -> vector<8x1xf32>
    %354 = vector.broadcast %353 : vector<8x1xf32> to vector<8x8xf32>
    %355 = arith.mulf %350, %354 : vector<8x8xf32>
    %cst_131 = arith.constant dense<0.000000e+00> : vector<8x8xf32>
    %356 = tpu.matmul %355, %339, %cst_131 {dimension_numbers = #tpu.dot_dimension_numbers<[1], [0], [0], [1], [0, 0, 1, 1], [], []>} : vector<8x8xf32>, vector<8x8xf32>, vector<8x8xf32> -> vector<8x8xf32>
    %357 = vector.extract_strided_slice %292 {offsets = [0, 24], sizes = [8, 8], strides = [1, 1]} : vector<16x32xf32> to vector<8x8xf32>
    %358 = vector.extract_strided_slice %293 {offsets = [0, 24], sizes = [8, 8], strides = [1, 1]} : vector<16x32xf32> to vector<8x8xf32>
    %359 = vector.extract_strided_slice %294 {offsets = [0, 24], sizes = [8, 8], strides = [1, 1]} : vector<16x32xf32> to vector<8x8xf32>
    %360 = tpu.transpose %358, [1, 0] : vector<8x8xf32> -> vector<8x8xf32>
    %cst_132 = arith.constant dense<0.000000e+00> : vector<8x8xf32>
    %361 = tpu.matmul %357, %360, %cst_132 {dimension_numbers = #tpu.dot_dimension_numbers<[1], [0], [0], [1], [0, 0, 1, 1], [], []>} : vector<8x8xf32>, vector<8x8xf32>, vector<8x8xf32> -> vector<8x8xf32>
    %cst_133 = arith.constant 0.353553385 : f32
    %362 = vector.broadcast %cst_133 : f32 to vector<8x8xf32>
    %363 = arith.mulf %361, %362 : vector<8x8xf32>
    %364 = vector.broadcast %296 : vector<1x8xf32> to vector<8x8xf32>
    %365 = arith.addf %363, %364 : vector<8x8xf32>
    %cst_134 = arith.constant dense<0xFF800000> : vector<8xf32>
    %366 = vector.multi_reduction <maximumf>, %365, %cst_134 [1] : vector<8x8xf32> to vector<8xf32>
    %367 = vector.shape_cast %366 : vector<8xf32> to vector<8x1xf32>
    %368 = vector.broadcast %367 : vector<8x1xf32> to vector<8x8xf32>
    %369 = arith.subf %365, %368 : vector<8x8xf32>
    %370 = math.exp %369 : vector<8x8xf32>
    %cst_135 = arith.constant dense<0.000000e+00> : vector<8xf32>
    %371 = vector.multi_reduction <add>, %370, %cst_135 [1] : vector<8x8xf32> to vector<8xf32>
    %372 = vector.shape_cast %371 : vector<8xf32> to vector<8x1xf32>
    %373 = tpu.reciprocal %372 {approx = true} : vector<8x1xf32> -> vector<8x1xf32>
    %374 = vector.broadcast %373 : vector<8x1xf32> to vector<8x8xf32>
    %375 = arith.mulf %370, %374 : vector<8x8xf32>
    %cst_136 = arith.constant dense<0.000000e+00> : vector<8x8xf32>
    %376 = tpu.matmul %375, %359, %cst_136 {dimension_numbers = #tpu.dot_dimension_numbers<[1], [0], [0], [1], [0, 0, 1, 1], [], []>} : vector<8x8xf32>, vector<8x8xf32>, vector<8x8xf32> -> vector<8x8xf32>
    %377 = tpu.concatenate %316, %336, %356, %376 in 1 : vector<8x8xf32>, vector<8x8xf32>, vector<8x8xf32>, vector<8x8xf32> -> vector<8x32xf32>
    %c1_137 = arith.constant 1 : index
    %c0_138 = arith.constant 0 : index
    %c0_139 = arith.constant 0 : index
    %378 = vector.load %arg1[%c1_137, %c0_138, %c0_139] : memref<2x1x8xf32, #tpu.memory_space<vmem>>, vector<1x1x8xf32>
    %379 = vector.shape_cast %378 : vector<1x1x8xf32> to vector<1x8xf32>
    %380 = vector.extract_strided_slice %292 {offsets = [8, 0], sizes = [8, 8], strides = [1, 1]} : vector<16x32xf32> to vector<8x8xf32>
    %381 = vector.extract_strided_slice %293 {offsets = [8, 0], sizes = [8, 8], strides = [1, 1]} : vector<16x32xf32> to vector<8x8xf32>
    %382 = vector.extract_strided_slice %294 {offsets = [8, 0], sizes = [8, 8], strides = [1, 1]} : vector<16x32xf32> to vector<8x8xf32>
    %383 = tpu.transpose %381, [1, 0] : vector<8x8xf32> -> vector<8x8xf32>
    %cst_140 = arith.constant dense<0.000000e+00> : vector<8x8xf32>
    %384 = tpu.matmul %380, %383, %cst_140 {dimension_numbers = #tpu.dot_dimension_numbers<[1], [0], [0], [1], [0, 0, 1, 1], [], []>} : vector<8x8xf32>, vector<8x8xf32>, vector<8x8xf32> -> vector<8x8xf32>
    %cst_141 = arith.constant 0.353553385 : f32
    %385 = vector.broadcast %cst_141 : f32 to vector<8x8xf32>
    %386 = arith.mulf %384, %385 : vector<8x8xf32>
    %387 = vector.broadcast %379 : vector<1x8xf32> to vector<8x8xf32>
    %388 = arith.addf %386, %387 : vector<8x8xf32>
    %cst_142 = arith.constant dense<0xFF800000> : vector<8xf32>
    %389 = vector.multi_reduction <maximumf>, %388, %cst_142 [1] : vector<8x8xf32> to vector<8xf32>
    %390 = vector.shape_cast %389 : vector<8xf32> to vector<8x1xf32>
    %391 = vector.broadcast %390 : vector<8x1xf32> to vector<8x8xf32>
    %392 = arith.subf %388, %391 : vector<8x8xf32>
    %393 = math.exp %392 : vector<8x8xf32>
    %cst_143 = arith.constant dense<0.000000e+00> : vector<8xf32>
    %394 = vector.multi_reduction <add>, %393, %cst_143 [1] : vector<8x8xf32> to vector<8xf32>
    %395 = vector.shape_cast %394 : vector<8xf32> to vector<8x1xf32>
    %396 = tpu.reciprocal %395 {approx = true} : vector<8x1xf32> -> vector<8x1xf32>
    %397 = vector.broadcast %396 : vector<8x1xf32> to vector<8x8xf32>
    %398 = arith.mulf %393, %397 : vector<8x8xf32>
    %cst_144 = arith.constant dense<0.000000e+00> : vector<8x8xf32>
    %399 = tpu.matmul %398, %382, %cst_144 {dimension_numbers = #tpu.dot_dimension_numbers<[1], [0], [0], [1], [0, 0, 1, 1], [], []>} : vector<8x8xf32>, vector<8x8xf32>, vector<8x8xf32> -> vector<8x8xf32>
    %400 = vector.extract_strided_slice %292 {offsets = [8, 8], sizes = [8, 8], strides = [1, 1]} : vector<16x32xf32> to vector<8x8xf32>
    %401 = vector.extract_strided_slice %293 {offsets = [8, 8], sizes = [8, 8], strides = [1, 1]} : vector<16x32xf32> to vector<8x8xf32>
    %402 = vector.extract_strided_slice %294 {offsets = [8, 8], sizes = [8, 8], strides = [1, 1]} : vector<16x32xf32> to vector<8x8xf32>
    %403 = tpu.transpose %401, [1, 0] : vector<8x8xf32> -> vector<8x8xf32>
    %cst_145 = arith.constant dense<0.000000e+00> : vector<8x8xf32>
    %404 = tpu.matmul %400, %403, %cst_145 {dimension_numbers = #tpu.dot_dimension_numbers<[1], [0], [0], [1], [0, 0, 1, 1], [], []>} : vector<8x8xf32>, vector<8x8xf32>, vector<8x8xf32> -> vector<8x8xf32>
    %cst_146 = arith.constant 0.353553385 : f32
    %405 = vector.broadcast %cst_146 : f32 to vector<8x8xf32>
    %406 = arith.mulf %404, %405 : vector<8x8xf32>
    %407 = vector.broadcast %379 : vector<1x8xf32> to vector<8x8xf32>
    %408 = arith.addf %406, %407 : vector<8x8xf32>
    %cst_147 = arith.constant dense<0xFF800000> : vector<8xf32>
    %409 = vector.multi_reduction <maximumf>, %408, %cst_147 [1] : vector<8x8xf32> to vector<8xf32>
    %410 = vector.shape_cast %409 : vector<8xf32> to vector<8x1xf32>
    %411 = vector.broadcast %410 : vector<8x1xf32> to vector<8x8xf32>
    %412 = arith.subf %408, %411 : vector<8x8xf32>
    %413 = math.exp %412 : vector<8x8xf32>
    %cst_148 = arith.constant dense<0.000000e+00> : vector<8xf32>
    %414 = vector.multi_reduction <add>, %413, %cst_148 [1] : vector<8x8xf32> to vector<8xf32>
    %415 = vector.shape_cast %414 : vector<8xf32> to vector<8x1xf32>
    %416 = tpu.reciprocal %415 {approx = true} : vector<8x1xf32> -> vector<8x1xf32>
    %417 = vector.broadcast %416 : vector<8x1xf32> to vector<8x8xf32>
    %418 = arith.mulf %413, %417 : vector<8x8xf32>
    %cst_149 = arith.constant dense<0.000000e+00> : vector<8x8xf32>
    %419 = tpu.matmul %418, %402, %cst_149 {dimension_numbers = #tpu.dot_dimension_numbers<[1], [0], [0], [1], [0, 0, 1, 1], [], []>} : vector<8x8xf32>, vector<8x8xf32>, vector<8x8xf32> -> vector<8x8xf32>
    %420 = vector.extract_strided_slice %292 {offsets = [8, 16], sizes = [8, 8], strides = [1, 1]} : vector<16x32xf32> to vector<8x8xf32>
    %421 = vector.extract_strided_slice %293 {offsets = [8, 16], sizes = [8, 8], strides = [1, 1]} : vector<16x32xf32> to vector<8x8xf32>
    %422 = vector.extract_strided_slice %294 {offsets = [8, 16], sizes = [8, 8], strides = [1, 1]} : vector<16x32xf32> to vector<8x8xf32>
    %423 = tpu.transpose %421, [1, 0] : vector<8x8xf32> -> vector<8x8xf32>
    %cst_150 = arith.constant dense<0.000000e+00> : vector<8x8xf32>
    %424 = tpu.matmul %420, %423, %cst_150 {dimension_numbers = #tpu.dot_dimension_numbers<[1], [0], [0], [1], [0, 0, 1, 1], [], []>} : vector<8x8xf32>, vector<8x8xf32>, vector<8x8xf32> -> vector<8x8xf32>
    %cst_151 = arith.constant 0.353553385 : f32
    %425 = vector.broadcast %cst_151 : f32 to vector<8x8xf32>
    %426 = arith.mulf %424, %425 : vector<8x8xf32>
    %427 = vector.broadcast %379 : vector<1x8xf32> to vector<8x8xf32>
    %428 = arith.addf %426, %427 : vector<8x8xf32>
    %cst_152 = arith.constant dense<0xFF800000> : vector<8xf32>
    %429 = vector.multi_reduction <maximumf>, %428, %cst_152 [1] : vector<8x8xf32> to vector<8xf32>
    %430 = vector.shape_cast %429 : vector<8xf32> to vector<8x1xf32>
    %431 = vector.broadcast %430 : vector<8x1xf32> to vector<8x8xf32>
    %432 = arith.subf %428, %431 : vector<8x8xf32>
    %433 = math.exp %432 : vector<8x8xf32>
    %cst_153 = arith.constant dense<0.000000e+00> : vector<8xf32>
    %434 = vector.multi_reduction <add>, %433, %cst_153 [1] : vector<8x8xf32> to vector<8xf32>
    %435 = vector.shape_cast %434 : vector<8xf32> to vector<8x1xf32>
    %436 = tpu.reciprocal %435 {approx = true} : vector<8x1xf32> -> vector<8x1xf32>
    %437 = vector.broadcast %436 : vector<8x1xf32> to vector<8x8xf32>
    %438 = arith.mulf %433, %437 : vector<8x8xf32>
    %cst_154 = arith.constant dense<0.000000e+00> : vector<8x8xf32>
    %439 = tpu.matmul %438, %422, %cst_154 {dimension_numbers = #tpu.dot_dimension_numbers<[1], [0], [0], [1], [0, 0, 1, 1], [], []>} : vector<8x8xf32>, vector<8x8xf32>, vector<8x8xf32> -> vector<8x8xf32>
    %440 = vector.extract_strided_slice %292 {offsets = [8, 24], sizes = [8, 8], strides = [1, 1]} : vector<16x32xf32> to vector<8x8xf32>
    %441 = vector.extract_strided_slice %293 {offsets = [8, 24], sizes = [8, 8], strides = [1, 1]} : vector<16x32xf32> to vector<8x8xf32>
    %442 = vector.extract_strided_slice %294 {offsets = [8, 24], sizes = [8, 8], strides = [1, 1]} : vector<16x32xf32> to vector<8x8xf32>
    %443 = tpu.transpose %441, [1, 0] : vector<8x8xf32> -> vector<8x8xf32>
    %cst_155 = arith.constant dense<0.000000e+00> : vector<8x8xf32>
    %444 = tpu.matmul %440, %443, %cst_155 {dimension_numbers = #tpu.dot_dimension_numbers<[1], [0], [0], [1], [0, 0, 1, 1], [], []>} : vector<8x8xf32>, vector<8x8xf32>, vector<8x8xf32> -> vector<8x8xf32>
    %cst_156 = arith.constant 0.353553385 : f32
    %445 = vector.broadcast %cst_156 : f32 to vector<8x8xf32>
    %446 = arith.mulf %444, %445 : vector<8x8xf32>
    %447 = vector.broadcast %379 : vector<1x8xf32> to vector<8x8xf32>
    %448 = arith.addf %446, %447 : vector<8x8xf32>
    %cst_157 = arith.constant dense<0xFF800000> : vector<8xf32>
    %449 = vector.multi_reduction <maximumf>, %448, %cst_157 [1] : vector<8x8xf32> to vector<8xf32>
    %450 = vector.shape_cast %449 : vector<8xf32> to vector<8x1xf32>
    %451 = vector.broadcast %450 : vector<8x1xf32> to vector<8x8xf32>
    %452 = arith.subf %448, %451 : vector<8x8xf32>
    %453 = math.exp %452 : vector<8x8xf32>
    %cst_158 = arith.constant dense<0.000000e+00> : vector<8xf32>
    %454 = vector.multi_reduction <add>, %453, %cst_158 [1] : vector<8x8xf32> to vector<8xf32>
    %455 = vector.shape_cast %454 : vector<8xf32> to vector<8x1xf32>
    %456 = tpu.reciprocal %455 {approx = true} : vector<8x1xf32> -> vector<8x1xf32>
    %457 = vector.broadcast %456 : vector<8x1xf32> to vector<8x8xf32>
    %458 = arith.mulf %453, %457 : vector<8x8xf32>
    %cst_159 = arith.constant dense<0.000000e+00> : vector<8x8xf32>
    %459 = tpu.matmul %458, %442, %cst_159 {dimension_numbers = #tpu.dot_dimension_numbers<[1], [0], [0], [1], [0, 0, 1, 1], [], []>} : vector<8x8xf32>, vector<8x8xf32>, vector<8x8xf32> -> vector<8x8xf32>
    %460 = tpu.concatenate %399, %419, %439, %459 in 1 : vector<8x8xf32>, vector<8x8xf32>, vector<8x8xf32>, vector<8x8xf32> -> vector<8x32xf32>
    %461 = tpu.concatenate %377, %460 in 0 : vector<8x32xf32>, vector<8x32xf32> -> vector<16x32xf32>
    %c1_160 = arith.constant 1 : index
    %c0_161 = arith.constant 0 : index
    %c0_162 = arith.constant 0 : index
    %462 = vector.load %arg6[%c1_160, %c0_161, %c0_162] : memref<2x32x32xf32, #tpu.memory_space<vmem>>, vector<1x32x32xf32>
    %463 = vector.shape_cast %462 : vector<1x32x32xf32> to vector<32x32xf32>
    %cst_163 = arith.constant dense<0.000000e+00> : vector<16x32xf32>
    %464 = tpu.matmul %461, %463, %cst_163 {dimension_numbers = #tpu.dot_dimension_numbers<[1], [0], [0], [1], [0, 0, 1, 1], [], []>} : vector<16x32xf32>, vector<32x32xf32>, vector<16x32xf32> -> vector<16x32xf32>
    %c1_164 = arith.constant 1 : index
    %c0_165 = arith.constant 0 : index
    %c0_166 = arith.constant 0 : index
    %465 = vector.load %arg7[%c1_164, %c0_165, %c0_166] : memref<2x1x32xf32, #tpu.memory_space<vmem>>, vector<1x1x32xf32>
    %466 = vector.shape_cast %465 : vector<1x1x32xf32> to vector<1x32xf32>
    %467 = vector.broadcast %466 : vector<1x32xf32> to vector<16x32xf32>
    %468 = arith.addf %464, %467 : vector<16x32xf32>
    %469 = arith.addf %468, %284 : vector<16x32xf32>
    %c1_167 = arith.constant 1 : index
    %c0_168 = arith.constant 0 : index
    %c0_169 = arith.constant 0 : index
    %470 = vector.load %arg8[%c1_167, %c0_168, %c0_169] : memref<2x1x32xf32, #tpu.memory_space<vmem>>, vector<1x1x32xf32>
    %471 = vector.shape_cast %470 : vector<1x1x32xf32> to vector<1x32xf32>
    %c1_170 = arith.constant 1 : index
    %c0_171 = arith.constant 0 : index
    %c0_172 = arith.constant 0 : index
    %472 = vector.load %arg9[%c1_170, %c0_171, %c0_172] : memref<2x1x32xf32, #tpu.memory_space<vmem>>, vector<1x1x32xf32>
    %473 = vector.shape_cast %472 : vector<1x1x32xf32> to vector<1x32xf32>
    %cst_173 = arith.constant dense<0.000000e+00> : vector<16xf32>
    %474 = vector.multi_reduction <add>, %469, %cst_173 [1] : vector<16x32xf32> to vector<16xf32>
    %475 = vector.shape_cast %474 : vector<16xf32> to vector<16x1xf32>
    %cst_174 = arith.constant 3.200000e+01 : f32
    %476 = vector.broadcast %cst_174 : f32 to vector<16x1xf32>
    %477 = arith.divf %475, %476 : vector<16x1xf32>
    %478 = vector.broadcast %477 : vector<16x1xf32> to vector<16x32xf32>
    %479 = arith.subf %469, %478 : vector<16x32xf32>
    %480 = arith.mulf %479, %479 : vector<16x32xf32>
    %cst_175 = arith.constant dense<0.000000e+00> : vector<16xf32>
    %481 = vector.multi_reduction <add>, %480, %cst_175 [1] : vector<16x32xf32> to vector<16xf32>
    %482 = vector.shape_cast %481 : vector<16xf32> to vector<16x1xf32>
    %cst_176 = arith.constant 3.200000e+01 : f32
    %483 = vector.broadcast %cst_176 : f32 to vector<16x1xf32>
    %484 = arith.divf %482, %483 : vector<16x1xf32>
    %485 = vector.broadcast %477 : vector<16x1xf32> to vector<16x32xf32>
    %486 = arith.subf %469, %485 : vector<16x32xf32>
    %cst_177 = arith.constant 9.99999996E-13 : f32
    %487 = vector.broadcast %cst_177 : f32 to vector<16x1xf32>
    %488 = arith.addf %484, %487 : vector<16x1xf32>
    %489 = math.rsqrt %488 : vector<16x1xf32>
    %490 = vector.broadcast %489 : vector<16x1xf32> to vector<16x32xf32>
    %491 = arith.mulf %486, %490 : vector<16x32xf32>
    %492 = vector.broadcast %471 : vector<1x32xf32> to vector<16x32xf32>
    %493 = arith.mulf %491, %492 : vector<16x32xf32>
    %494 = vector.broadcast %473 : vector<1x32xf32> to vector<16x32xf32>
    %495 = arith.addf %493, %494 : vector<16x32xf32>
    %c1_178 = arith.constant 1 : index
    %c0_179 = arith.constant 0 : index
    %c0_180 = arith.constant 0 : index
    %496 = vector.load %arg10[%c1_178, %c0_179, %c0_180] : memref<2x32x64xf32, #tpu.memory_space<vmem>>, vector<1x32x64xf32>
    %497 = vector.shape_cast %496 : vector<1x32x64xf32> to vector<32x64xf32>
    %cst_181 = arith.constant dense<0.000000e+00> : vector<16x64xf32>
    %498 = tpu.matmul %495, %497, %cst_181 {dimension_numbers = #tpu.dot_dimension_numbers<[1], [0], [0], [1], [0, 0, 1, 1], [], []>} : vector<16x32xf32>, vector<32x64xf32>, vector<16x64xf32> -> vector<16x64xf32>
    %c1_182 = arith.constant 1 : index
    %c0_183 = arith.constant 0 : index
    %c0_184 = arith.constant 0 : index
    %499 = vector.load %arg11[%c1_182, %c0_183, %c0_184] : memref<2x1x64xf32, #tpu.memory_space<vmem>>, vector<1x1x64xf32>
    %500 = vector.shape_cast %499 : vector<1x1x64xf32> to vector<1x64xf32>
    %501 = vector.broadcast %500 : vector<1x64xf32> to vector<16x64xf32>
    %502 = arith.addf %498, %501 : vector<16x64xf32>
    %cst_185 = arith.constant 5.000000e-01 : f32
    %503 = vector.broadcast %cst_185 : f32 to vector<16x64xf32>
    %504 = arith.mulf %503, %502 : vector<16x64xf32>
    %cst_186 = arith.constant 0.707106769 : f32
    %505 = vector.broadcast %cst_186 : f32 to vector<16x64xf32>
    %506 = arith.mulf %502, %505 : vector<16x64xf32>
    %507 = math.erf %506 : vector<16x64xf32>
    %cst_187 = arith.constant 1.000000e+00 : f32
    %508 = vector.broadcast %cst_187 : f32 to vector<16x64xf32>
    %509 = arith.addf %508, %507 : vector<16x64xf32>
    %510 = arith.mulf %504, %509 : vector<16x64xf32>
    %c1_188 = arith.constant 1 : index
    %c0_189 = arith.constant 0 : index
    %c0_190 = arith.constant 0 : index
    %511 = vector.load %arg12[%c1_188, %c0_189, %c0_190] : memref<2x64x32xf32, #tpu.memory_space<vmem>>, vector<1x64x32xf32>
    %512 = vector.shape_cast %511 : vector<1x64x32xf32> to vector<64x32xf32>
    %cst_191 = arith.constant dense<0.000000e+00> : vector<16x32xf32>
    %513 = tpu.matmul %510, %512, %cst_191 {dimension_numbers = #tpu.dot_dimension_numbers<[1], [0], [0], [1], [0, 0, 1, 1], [], []>} : vector<16x64xf32>, vector<64x32xf32>, vector<16x32xf32> -> vector<16x32xf32>
    %c1_192 = arith.constant 1 : index
    %c0_193 = arith.constant 0 : index
    %c0_194 = arith.constant 0 : index
    %514 = vector.load %arg13[%c1_192, %c0_193, %c0_194] : memref<2x1x32xf32, #tpu.memory_space<vmem>>, vector<1x1x32xf32>
    %515 = vector.shape_cast %514 : vector<1x1x32xf32> to vector<1x32xf32>
    %516 = vector.broadcast %515 : vector<1x32xf32> to vector<16x32xf32>
    %517 = arith.addf %513, %516 : vector<16x32xf32>
    %518 = arith.addf %517, %495 : vector<16x32xf32>
    %c1_195 = arith.constant 1 : index
    %c0_196 = arith.constant 0 : index
    %c0_197 = arith.constant 0 : index
    %519 = vector.load %arg14[%c1_195, %c0_196, %c0_197] : memref<2x1x32xf32, #tpu.memory_space<vmem>>, vector<1x1x32xf32>
    %520 = vector.shape_cast %519 : vector<1x1x32xf32> to vector<1x32xf32>
    %c1_198 = arith.constant 1 : index
    %c0_199 = arith.constant 0 : index
    %c0_200 = arith.constant 0 : index
    %521 = vector.load %arg15[%c1_198, %c0_199, %c0_200] : memref<2x1x32xf32, #tpu.memory_space<vmem>>, vector<1x1x32xf32>
    %522 = vector.shape_cast %521 : vector<1x1x32xf32> to vector<1x32xf32>
    %cst_201 = arith.constant dense<0.000000e+00> : vector<16xf32>
    %523 = vector.multi_reduction <add>, %518, %cst_201 [1] : vector<16x32xf32> to vector<16xf32>
    %524 = vector.shape_cast %523 : vector<16xf32> to vector<16x1xf32>
    %cst_202 = arith.constant 3.200000e+01 : f32
    %525 = vector.broadcast %cst_202 : f32 to vector<16x1xf32>
    %526 = arith.divf %524, %525 : vector<16x1xf32>
    %527 = vector.broadcast %526 : vector<16x1xf32> to vector<16x32xf32>
    %528 = arith.subf %518, %527 : vector<16x32xf32>
    %529 = arith.mulf %528, %528 : vector<16x32xf32>
    %cst_203 = arith.constant dense<0.000000e+00> : vector<16xf32>
    %530 = vector.multi_reduction <add>, %529, %cst_203 [1] : vector<16x32xf32> to vector<16xf32>
    %531 = vector.shape_cast %530 : vector<16xf32> to vector<16x1xf32>
    %cst_204 = arith.constant 3.200000e+01 : f32
    %532 = vector.broadcast %cst_204 : f32 to vector<16x1xf32>
    %533 = arith.divf %531, %532 : vector<16x1xf32>
    %534 = vector.broadcast %526 : vector<16x1xf32> to vector<16x32xf32>
    %535 = arith.subf %518, %534 : vector<16x32xf32>
    %cst_205 = arith.constant 9.99999996E-13 : f32
    %536 = vector.broadcast %cst_205 : f32 to vector<16x1xf32>
    %537 = arith.addf %533, %536 : vector<16x1xf32>
    %538 = math.rsqrt %537 : vector<16x1xf32>
    %539 = vector.broadcast %538 : vector<16x1xf32> to vector<16x32xf32>
    %540 = arith.mulf %535, %539 : vector<16x32xf32>
    %541 = vector.broadcast %520 : vector<1x32xf32> to vector<16x32xf32>
    %542 = arith.mulf %540, %541 : vector<16x32xf32>
    %543 = vector.broadcast %522 : vector<1x32xf32> to vector<16x32xf32>
    %544 = arith.addf %542, %543 : vector<16x32xf32>
    %c0_206 = arith.constant 0 : index
    %c0_207 = arith.constant 0 : index
    %545 = vector.load %arg16[%c0_206, %c0_207] : memref<32x32xf32, #tpu.memory_space<vmem>>, vector<32x32xf32>
    %cst_208 = arith.constant dense<0.000000e+00> : vector<16x32xf32>
    %546 = tpu.matmul %544, %545, %cst_208 {dimension_numbers = #tpu.dot_dimension_numbers<[1], [0], [0], [1], [0, 0, 1, 1], [], []>} : vector<16x32xf32>, vector<32x32xf32>, vector<16x32xf32> -> vector<16x32xf32>
    %c0_209 = arith.constant 0 : index
    %c0_210 = arith.constant 0 : index
    %547 = vector.load %arg17[%c0_209, %c0_210] : memref<1x32xf32, #tpu.memory_space<vmem>>, vector<1x32xf32>
    %548 = vector.broadcast %547 : vector<1x32xf32> to vector<16x32xf32>
    %549 = arith.addf %546, %548 : vector<16x32xf32>
    %cst_211 = arith.constant 5.000000e-01 : f32
    %550 = vector.broadcast %cst_211 : f32 to vector<16x32xf32>
    %551 = arith.mulf %550, %549 : vector<16x32xf32>
    %cst_212 = arith.constant 0.707106769 : f32
    %552 = vector.broadcast %cst_212 : f32 to vector<16x32xf32>
    %553 = arith.mulf %549, %552 : vector<16x32xf32>
    %554 = math.erf %553 : vector<16x32xf32>
    %cst_213 = arith.constant 1.000000e+00 : f32
    %555 = vector.broadcast %cst_213 : f32 to vector<16x32xf32>
    %556 = arith.addf %555, %554 : vector<16x32xf32>
    %557 = arith.mulf %551, %556 : vector<16x32xf32>
    %c0_214 = arith.constant 0 : index
    %c0_215 = arith.constant 0 : index
    %558 = vector.load %arg18[%c0_214, %c0_215] : memref<32x32xf32, #tpu.memory_space<vmem>>, vector<32x32xf32>
    %cst_216 = arith.constant dense<0.000000e+00> : vector<16x32xf32>
    %559 = tpu.matmul %557, %558, %cst_216 {dimension_numbers = #tpu.dot_dimension_numbers<[1], [0], [0], [1], [0, 0, 1, 1], [], []>} : vector<16x32xf32>, vector<32x32xf32>, vector<16x32xf32> -> vector<16x32xf32>
    %c0_217 = arith.constant 0 : index
    %c0_218 = arith.constant 0 : index
    %560 = vector.load %arg19[%c0_217, %c0_218] : memref<1x32xf32, #tpu.memory_space<vmem>>, vector<1x32xf32>
    %561 = vector.broadcast %560 : vector<1x32xf32> to vector<16x32xf32>
    %562 = arith.addf %559, %561 : vector<16x32xf32>
    %c0_219 = arith.constant 0 : index
    %c0_220 = arith.constant 0 : index
    %563 = vector.load %arg20[%c0_219, %c0_220] : memref<1x32xf32, #tpu.memory_space<vmem>>, vector<1x32xf32>
    %c0_221 = arith.constant 0 : index
    %c0_222 = arith.constant 0 : index
    %564 = vector.load %arg21[%c0_221, %c0_222] : memref<1x32xf32, #tpu.memory_space<vmem>>, vector<1x32xf32>
    %cst_223 = arith.constant dense<0.000000e+00> : vector<16xf32>
    %565 = vector.multi_reduction <add>, %562, %cst_223 [1] : vector<16x32xf32> to vector<16xf32>
    %566 = vector.shape_cast %565 : vector<16xf32> to vector<16x1xf32>
    %cst_224 = arith.constant 3.200000e+01 : f32
    %567 = vector.broadcast %cst_224 : f32 to vector<16x1xf32>
    %568 = arith.divf %566, %567 : vector<16x1xf32>
    %569 = vector.broadcast %568 : vector<16x1xf32> to vector<16x32xf32>
    %570 = arith.subf %562, %569 : vector<16x32xf32>
    %571 = arith.mulf %570, %570 : vector<16x32xf32>
    %cst_225 = arith.constant dense<0.000000e+00> : vector<16xf32>
    %572 = vector.multi_reduction <add>, %571, %cst_225 [1] : vector<16x32xf32> to vector<16xf32>
    %573 = vector.shape_cast %572 : vector<16xf32> to vector<16x1xf32>
    %cst_226 = arith.constant 3.200000e+01 : f32
    %574 = vector.broadcast %cst_226 : f32 to vector<16x1xf32>
    %575 = arith.divf %573, %574 : vector<16x1xf32>
    %576 = vector.broadcast %568 : vector<16x1xf32> to vector<16x32xf32>
    %577 = arith.subf %562, %576 : vector<16x32xf32>
    %cst_227 = arith.constant 9.99999974E-6 : f32
    %578 = vector.broadcast %cst_227 : f32 to vector<16x1xf32>
    %579 = arith.addf %575, %578 : vector<16x1xf32>
    %580 = math.rsqrt %579 : vector<16x1xf32>
    %581 = vector.broadcast %580 : vector<16x1xf32> to vector<16x32xf32>
    %582 = arith.mulf %577, %581 : vector<16x32xf32>
    %583 = vector.broadcast %563 : vector<1x32xf32> to vector<16x32xf32>
    %584 = arith.mulf %582, %583 : vector<16x32xf32>
    %585 = vector.broadcast %564 : vector<1x32xf32> to vector<16x32xf32>
    %586 = arith.addf %584, %585 : vector<16x32xf32>
    %c0_228 = arith.constant 0 : index
    %c0_229 = arith.constant 0 : index
    %587 = vector.load %arg22[%c0_228, %c0_229] : memref<16x32xf32, #tpu.memory_space<vmem>>, vector<16x32xf32>
    tpu.vector_store %arg22[%c0_228, %c0_229], %586 {strides = array<i32>} : memref<16x32xf32, #tpu.memory_space<vmem>>, vector<16x32xf32>,
    return
  }
}

</mosaic_0001>

<bundles_post_ra>
// kernel: bert_encoder_forward.1
= control target key start
LH: loop header
LB: loop body
LE: loop exit
PB: predicated region body
PF: predicated region fallthrough
CT: control target
= control target key end

     0   :  { %s5654_s0 = inlined_call_operand.vmem [shape: f32[16,32], index: 0, kind: input, shape index: {}]   ;;  %s5655_s1 = inlined_call_operand.vmem [shape: f32[2,1,8], index: 1, kind: input, shape index: {}]   ;;  %s5656_s2 = inlined_call_operand.vmem [shape: f32[1,32], index: 2, kind: input, shape index: {}]   ;;  %s5657_s3 = inlined_call_operand.vmem [shape: f32[1,32], index: 3, kind: input, shape index: {}]   ;;  %s5658_s4 = inlined_call_operand.vmem [shape: f32[2,32,96], index: 4, kind: input, shape index: {}]   ;;  %s5659_s5 = inlined_call_operand.vmem [shape: f32[2,1,96], index: 5, kind: input, shape index: {}]   ;;  %s5660_s6 = inlined_call_operand.vmem [shape: f32[2,32,32], index: 6, kind: input, shape index: {}]   ;;  %s5661_s7 = inlined_call_operand.vmem [shape: f32[2,1,32], index: 7, kind: input, shape index: {}]   ;;  %s5662_s8 = inlined_call_operand.vmem [shape: f32[2,1,32], index: 8, kind: input, shape index: {}]   ;;  %s5663_s9 = inlined_call_operand.vmem [shape: f32[2,1,32], index: 9, kind: input, shape index: {}]   ;;  %s5664_s10 = inlined_call_operand.vmem [shape: f32[2,32,64], index: 10, kind: input, shape index: {}]   ;;  %s5665_s11 = inlined_call_operand.vmem [shape: f32[2,1,64], index: 11, kind: input, shape index: {}]   ;;  %s5666_s12 = inlined_call_operand.vmem [shape: f32[2,64,32], index: 12, kind: input, shape index: {}]   ;;  %s5667_s13 = inlined_call_operand.vmem [shape: f32[2,1,32], index: 13, kind: input, shape index: {}]   ;;  %s5668_s14 = inlined_call_operand.vmem [shape: f32[2,1,32], index: 14, kind: input, shape index: {}]   ;;  %s5669_s15 = inlined_call_operand.vmem [shape: f32[2,1,32], index: 15, kind: input, shape index: {}]   ;;  %s5670_s16 = inlined_call_operand.vmem [shape: f32[32,32], index: 16, kind: input, shape index: {}]   ;;  %s5671_s17 = inlined_call_operand.vmem [shape: f32[1,32], index: 17, kind: input, shape index: {}]   ;;  %s5672_s18 = inlined_call_operand.vmem [shape: f32[32,32], index: 18, kind: input, shape index: {}]   ;;  %s5673_s19 = inlined_call_operand.vmem [shape: f32[1,32], index: 19, kind: input, shape index: {}]   ;;  %s5674_s20 = inlined_call_operand.vmem [shape: f32[1,32], index: 20, kind: input, shape index: {}]   ;;  %s5675_s21 = inlined_call_operand.vmem [shape: f32[1,32], index: 21, kind: input, shape index: {}]   ;;  %s5676_s22 = inlined_call_operand.hbm [shape: f32[16,32], index: 22, kind: output, shape index: {}]  }
   0x1   :  { %5702 = sst [smem:[#allocation5_spill]] %s5654_s0 }
   0x2   :  { %5703 = sst [smem:[#allocation6_spill]] %s5655_s1 }
   0x3   :  { %5704 = sst [smem:[#allocation7_spill]] %s5656_s2 }
   0x4   :  { %5705 = sst [smem:[#allocation8_spill]] %s5657_s3 }
   0x5   :  { %5706 = sst [smem:[#allocation9_spill]] %s5658_s4 }
   0x6   :  { %5707 = sst [smem:[#allocation10_spill]] %s5659_s5 }
   0x7   :  { %5708 = sst [smem:[#allocation11_spill]] %s5660_s6 }
   0x8   :  { %s5709_s29 = sld [smem:[#allocation5_spill]]  ;;  %vm76_vm0 = vcmask 261120  }
   0xe   :  { %v72_v0 = vld [vmem:[%s5709_s29] sm:$0xff]  ;;  %v73_v1 = vld [vmem:[%s5709_s29 + $0x8] sm:$0xff] }
   0xf   :  { %27 = vsyncpa [#allocation3], 0  ;;  %v77_v2 = vsel %vm76_vm0, %v72_v0, 0.0  ;;  %v80_v3 = vsel %vm76_vm0, %v73_v1, 0.0  ;;  %s5710_s1 = sld [smem:[#allocation9_spill]]  ;;  %s5711_s28 = sld [smem:[#allocation7_spill]] }
  0x10   :  { %78 = vadd.xlane.f32.xlu0 %v77_v2  ;;  %s5712_s4 = sld [smem:[#allocation8_spill]]  ;;  %v4860_v36 = vmov 0.0   ;;  %vm4861_vm1 = vmmov 0   ;;  %s5713_s5 = sld [smem:[#allocation10_spill]]  ;;  %vm216_vm2 = vcmask 64512   ;;  %vm900_vm3 = vcmask 130048  }
  0x11   :  { %4347 = vmatprep.subr.mxu1 %v4860_v36  ;;  %4349 = vmatprep.mubr.msk.f32.mxu1 %vm4861_vm1, %v4860_v36  ;;  %s4862_s24 = smov 88   ;;  %s4863_s6 = smov 96   ;;  %vm902_vm4 = vcmask 195584   ;;  %vm1849_vm5 = vcmask 523264  }
  0x12   :  { %s5698_s25 = smov 120   ;;  %s5696_s26 = smov 112  }
  0x13   :  { %s5694_s2 = smov 80   ;;  %s5692_s27 = smov 104  }
  0x14   :  { %81 = vadd.xlane.f32.xlu0 %v80_v3  ;;  %s5690_s3 = smov 72   ;;  %s5714_s30 = sld [smem:[#allocation6_spill]] }
  0x15   :  { %v120_v14 = vld [vmem:[%s5710_s1] sm:$0xff]  ;;  %v121_v15 = vld [vmem:[%s5710_s1 + $0x8] sm:$0xff]  ;;  %v122_v16 = vld [vmem:[%s5710_s1 + $0x10] sm:$0xff]  ;;  %s5688_s23 = smov 64   ;;  %s5684_s29 = smov 40  }
  0x16   :  { %v4622_v17 = vpack.c.bf16 %v121_v15, %v120_v14  ;;  %v123_v18 = vld [vmem:[%s5710_s1 + $0x18] sm:$0xff]  ;;  %v4083_v27 = vld [vmem:[%s5711_s28] ss:$0 sm:$0xff]  ;;  %s5686_s28 = smov 48   ;;  %s5716_s0 = smov 120  }
  0x17   :  { %v4626_v19 = vpack.c.bf16 %v123_v18, %v122_v16  ;;  %v4084_v29 = vld [vmem:[%s5712_s4] ss:$0 sm:$0xff]  ;;  %s4873_s4 = smov 8  }
  0x18   :  { %4623 = vmatprep.subr.bf16.mxu0 %v4622_v17  ;;  %v4085_v37 = vld [vmem:[%s5713_s5] ss:$0 sm:$0xff] }
  0x19   :  { %4625 = vmatpush3.bf16.msra.mxu0 %v4622_v17 }
  0x1a   :  { %4627 = vmatprep.subr.bf16.mxu0 %v4626_v19  ;;  %v5112_v57 = vld [vmem:[%s5714_s30] ss:$0 sm:$0xff] }
  0x1d   :  { %4629 = vmatpush3.bf16.msra.mxu0 %v4626_v19 }
  0x1e   :  { %4357 = vmatprep.subr.mxu0 %v4860_v36 }
  0x9d   :  { %v79_v4 = vpop.xlane.xlu0 %78 }
  0x9e   :  { %v84_v5 = vmul.f32 0.03125, %v79_v4 }
  0xa0   :  { %v86_v6 = vsub.f32 %v72_v0, %v84_v5 }
  0xa1   :  { %v82_v7 = vpop.xlane.xlu0 %81 }
  0xa2   :  { %v85_v8 = vmul.f32 0.03125, %v82_v7  ;;  %v88_v9 = vmul.f32 %v86_v6, %v86_v6 }
  0xa4   :  { %v87_v10 = vsub.f32 %v73_v1, %v85_v8  ;;  %v90_v11 = vsel %vm76_vm0, %v88_v9, 0.0 }
  0xa5   :  { %91 = vadd.xlane.f32.xlu1 %v90_v11 }
  0xa6   :  { %v89_v12 = vmul.f32 %v87_v10, %v87_v10 }
  0xa8   :  { %v93_v13 = vsel %vm76_vm0, %v89_v12, 0.0 }
  0xa9   :  { %94 = vadd.xlane.f32.xlu1 %v93_v13  ;;  %v5127_v13 = vld [vmem:[%s5714_s30 + $0x1] ss:$0 sm:$0xff]  ;;  %s5682_s30 = smov 56  }
 0x132   :  { %v92_v20 = vpop.xlane.xlu1 %91 }
 0x133   :  { %v96_v21 = vmul.f32 0.03125, %v92_v20 }
 0x135   :  { %v98_v22 = vadd.f32 1e-12, %v96_v21 }
 0x136   :  { %v95_v23 = vpop.xlane.xlu1 %94 }
 0x137   :  { %4736 = vrsqrt.f32 %v98_v22  ;;  %v97_v24 = vmul.f32 0.03125, %v95_v23 }
 0x139   :  { %v99_v25 = vadd.f32 1e-12, %v97_v24 }
 0x13b   :  { %4738 = vrsqrt.f32 %v99_v25 }
 0x141   :  { %v4737_v26 = vpop.eup %4736 }
 0x142   :  { %v102_v28 = vmul.f32 %v4737_v26, %v86_v6 }
 0x144   :  { %v110_v30 = vmul.f32 %v4083_v27, %v102_v28 }
 0x145   :  { %v4739_v31 = vpop.eup %4738 }
 0x146   :  { %v103_v32 = vmul.f32 %v4739_v31, %v87_v10  ;;  %v5021_v33 = vadd.f32 %v4084_v29, %v110_v30 }
 0x148   :  { %v111_v34 = vmul.f32 %v4083_v27, %v103_v32  ;;  %4344 = vmatprep.mubr.msk.f32.mxu0 %vm76_vm0, %v5021_v33 }
 0x14a   :  { %v5025_v35 = vadd.f32 %v4084_v29, %v111_v34 }
 0x14c   :  { %4345 = vmatmul.mubr.msk.f32.vlgmr.msra.gmra.mrb[0].mxu0 %vm76_vm0, %v5025_v35 }
 0x14d   :  { %4359 = vmatprep.mubr.msk.f32.mxu0 %vm4861_vm1, %v4860_v36 }
 0x21f   :  { %v4346_v38 = vpop.f32.mrb[0].mxu0 }
 0x220   :  { %v203_v39 = vpop.f32.mrb[1].mxu0  ;;  %v5052_v41 = vadd.f32 %v4346_v38, %v4085_v37 }
 0x221   :  { %v5038_v40 = vadd.f32 %v4085_v37, %v203_v39 }
 0x223   :  { %388 = vrot.lane.b32.xlu1 %v5038_v40, %s4862_s24  ;;  %214 = vrot.lane.b32.xlu0 %v5038_v40, %s4863_s6 }
 0x227   :  { %386 = vrot.lane.b32.xlu1 %v5038_v40, %s5698_s25  ;;  %553 = vrot.lane.b32.xlu0 %v5038_v40, %s5696_s26 }
 0x22b   :  { %555 = vrot.lane.b32.xlu1 %v5038_v40, %s5694_s2  ;;  %720 = vrot.lane.b32.xlu0 %v5038_v40, %s5692_s27 }
 0x22f   :  { %722 = vrot.lane.b32.xlu1 %v5038_v40, %s5690_s3  ;;  %1080 = vrot.lane.b32.xlu0 %v5052_v41, %s4862_s24 }
 0x233   :  { %907 = vrot.lane.b32.xlu1 %v5052_v41, %s4863_s6  ;;  %1247 = vrot.lane.b32.xlu0 %v5052_v41, %s5694_s2  ;;  %s5720_s2 = smov 72  }
 0x237   :  { %1078 = vrot.lane.b32.xlu1 %v5052_v41, %s5698_s25  ;;  %1414 = vrot.lane.b32.xlu0 %v5052_v41, %s5690_s3  ;;  %s4874_s3 = smov 16   ;;  %s5717_s25 = smov 112  }
 0x23b   :  { %1245 = vrot.lane.b32.xlu1 %v5052_v41, %s5696_s26  ;;  %s5718_s26 = smov 80  }
 0x23f   :  { %1412 = vrot.lane.b32.xlu1 %v5052_v41, %s5692_s27  ;;  %s5723_s27 = smov 40  }
 0x295   :  { %v389_v42 = vpop.permute.xlu1 %388  ;;  %v215_v43 = vpop.permute.xlu0 %214 }
 0x296   :  { %4348 = vmatpush3.xpose.msk.msra.mxu1 %vm216_vm2, %v215_v43  ;;  %4358 = vmatpush3.xpose.msk.msra.mxu0 %vm216_vm2, %v389_v42 }
 0x297   :  { %4367 = vmatprep.subr.mxu0 %v4860_v36  ;;  %4352 = vmatprep.subr.mxu1 %v4860_v36 }
 0x299   :  { %v387_v44 = vpop.permute.xlu1 %386  ;;  %4350 = vmatmul.mubr.msk.f32.vlgmr.msra.gmra.mrb[0].mxu1 %vm216_vm2, %v5038_v40  ;;  %v554_v45 = vpop.permute.xlu0 %553 }
 0x29a   :  { %4360 = vmatmul.mubr.msk.f32.vlgmr.msra.gmra.mrb[2].mxu0 %vm216_vm2, %v387_v44  ;;  %4354 = vmatprep.mubr.msk.f32.mxu1 %vm4861_vm1, %v4860_v36 }
 0x29b   :  { %4369 = vmatprep.mubr.msk.f32.mxu0 %vm4861_vm1, %v4860_v36 }
 0x29d   :  { %v556_v46 = vpop.permute.xlu1 %555  ;;  %v721_v47 = vpop.permute.xlu0 %720 }
 0x29e   :  { %4368 = vmatpush3.xpose.msk.msra.mxu0 %vm216_vm2, %v556_v46 }
 0x29f   :  { %4377 = vmatprep.subr.mxu0 %v4860_v36 }
 0x2a1   :  { %v723_v48 = vpop.permute.xlu1 %722  ;;  %4370 = vmatmul.mubr.msk.f32.vlgmr.msra.gmra.mrb[4].mxu0 %vm216_vm2, %v554_v45  ;;  %v1081_v49 = vpop.permute.xlu0 %1080 }
 0x2a2   :  { %4378 = vmatpush3.xpose.msk.msra.mxu0 %vm216_vm2, %v723_v48  ;;  %4379 = vmatprep.mubr.msk.f32.mxu0 %vm4861_vm1, %v4860_v36 }
 0x2a3   :  { %4387 = vmatprep.subr.mxu0 %v4860_v36 }
 0x2a5   :  { %v908_v50 = vpop.permute.xlu1 %907  ;;  %4380 = vmatmul.mubr.msk.f32.vlgmr.msra.gmra.mrb[6].mxu0 %vm216_vm2, %v721_v47  ;;  %v1248_v52 = vpop.permute.xlu0 %1247 }
 0x2a6   :  { %4388 = vmatpush3.xpose.msk.msra.mxu0 %vm216_vm2, %v908_v50  ;;  %4389 = vmatprep.mubr.msk.f32.mxu0 %vm4861_vm1, %v4860_v36 }
 0x2a7   :  { %4397 = vmatprep.subr.mxu0 %v4860_v36 }
 0x2a9   :  { %v1079_v51 = vpop.permute.xlu1 %1078  ;;  %4390 = vmatmul.mubr.msk.f32.vlgmr.msra.gmra.mrb[8].mxu0 %vm216_vm2, %v5052_v41  ;;  %v1415_v54 = vpop.permute.xlu0 %1414 }
 0x2aa   :  { %4398 = vmatpush3.xpose.msk.msra.mxu0 %vm216_vm2, %v1081_v49  ;;  %4399 = vmatprep.mubr.msk.f32.mxu0 %vm4861_vm1, %v4860_v36 }
 0x2ab   :  { %4407 = vmatprep.subr.mxu0 %v4860_v36 }
 0x2ad   :  { %4400 = vmatmul.mubr.msk.f32.vlgmr.msra.gmra.mrb[10].mxu0 %vm216_vm2, %v1079_v51  ;;  %v1246_v53 = vpop.permute.xlu1 %1245 }
 0x2ae   :  { %4408 = vmatpush3.xpose.msk.msra.mxu0 %vm216_vm2, %v1248_v52  ;;  %4409 = vmatprep.mubr.msk.f32.mxu0 %vm4861_vm1, %v4860_v36 }
 0x2af   :  { %4417 = vmatprep.subr.mxu0 %v4860_v36 }
 0x2b1   :  { %4410 = vmatmul.mubr.msk.f32.vlgmr.msra.gmra.mrb[12].mxu0 %vm216_vm2, %v1246_v53  ;;  %v1413_v55 = vpop.permute.xlu1 %1412 }
 0x2b2   :  { %4418 = vmatpush3.xpose.msk.msra.mxu0 %vm216_vm2, %v1415_v54  ;;  %4419 = vmatprep.mubr.msk.f32.mxu0 %vm4861_vm1, %v4860_v36 }
 0x2b5   :  { %4420 = vmatmul.mubr.msk.f32.vlgmr.msra.gmra.mrb[14].mxu0 %vm216_vm2, %v1413_v55 }
 0x36c   :  { %v287_v56 = vpop.f32.mrb[0].mxu1 }
 0x36d   :  { %v291_v58 = vmul.f32 0.35355338, %v287_v56  ;;  %v4351_v59 = vpop.f32.mrb[1].mxu1  ;;  %v460_v60 = vpop.f32.mrb[2].mxu0 }
 0x36e   :  { %v464_v61 = vmul.f32 0.35355338, %v460_v60  ;;  %v4361_v62 = vpop.f32.mrb[3].mxu0 }
 0x36f   :  { %v298_v63 = vadd.f32 %v5112_v57, %v291_v58 }
 0x370   :  { %v465_v0 = vadd.f32 %v5112_v57, %v464_v61 }
 0x371   :  { %v299_v1 = vsel %vm216_vm2, %v298_v63, -inf }
 0x372   :  { %300 = vmax.xlane.f32.xlu0 %v299_v1  ;;  %v466_v2 = vsel %vm216_vm2, %v465_v0, -inf }
 0x373   :  { %467 = vmax.xlane.f32.xlu1 %v466_v2 }
 0x374   :  { %v627_v3 = vpop.f32.mrb[4].mxu0 }
 0x375   :  { %v631_v4 = vmul.f32 0.35355338, %v627_v3  ;;  %v4371_v5 = vpop.f32.mrb[5].mxu0 }
 0x377   :  { %v5119_v6 = vadd.f32 %v5112_v57, %v631_v4 }
 0x378   :  { %v794_v7 = vpop.f32.mrb[6].mxu0 }
 0x379   :  { %v798_v8 = vmul.f32 0.35355338, %v794_v7  ;;  %v4381_v9 = vpop.f32.mrb[7].mxu0  ;;  %v633_v10 = vsel %vm216_vm2, %v5119_v6, -inf }
 0x37a   :  { %634 = vmax.xlane.f32.xlu0 %v633_v10 }
 0x37b   :  { %v799_v11 = vadd.f32 %v5112_v57, %v798_v8 }
 0x37c   :  { %v979_v12 = vpop.f32.mrb[8].mxu0 }
 0x37d   :  { %v983_v14 = vmul.f32 0.35355338, %v979_v12  ;;  %v4391_v15 = vpop.f32.mrb[9].mxu0  ;;  %v800_v16 = vsel %vm216_vm2, %v799_v11, -inf }
 0x37e   :  { %801 = vmax.xlane.f32.xlu0 %v800_v16 }
 0x37f   :  { %v5131_v17 = vadd.f32 %v5127_v13, %v983_v14 }
 0x380   :  { %v1152_v18 = vpop.f32.mrb[10].mxu0 }
 0x381   :  { %v1156_v19 = vmul.f32 0.35355338, %v1152_v18  ;;  %v4401_v20 = vpop.f32.mrb[11].mxu0  ;;  %v991_v21 = vsel %vm216_vm2, %v5131_v17, -inf }
 0x382   :  { %992 = vmax.xlane.f32.xlu0 %v991_v21 }
 0x383   :  { %v1157_v22 = vadd.f32 %v5127_v13, %v1156_v19 }
 0x384   :  { %v1319_v23 = vpop.f32.mrb[12].mxu0 }
 0x385   :  { %v1323_v24 = vmul.f32 0.35355338, %v1319_v23  ;;  %v4411_v25 = vpop.f32.mrb[13].mxu0  ;;  %v1158_v26 = vsel %vm216_vm2, %v1157_v22, -inf }
 0x386   :  { %1159 = vmax.xlane.f32.xlu1 %v1158_v26 }
 0x387   :  { %v1324_v27 = vadd.f32 %v5127_v13, %v1323_v24 }
 0x388   :  { %v1486_v28 = vpop.f32.mrb[14].mxu0 }
 0x389   :  { %v4421_v29 = vpop.f32.mrb[15].mxu0  ;;  %v1325_v30 = vsel %vm216_vm2, %v1324_v27, -inf  ;;  %v1490_v31 = vmul.f32 0.35355338, %v1486_v28 }
 0x38a   :  { %1326 = vmax.xlane.f32.xlu0 %v1325_v30 }
 0x38b   :  { %v1491_v32 = vadd.f32 %v5127_v13, %v1490_v31 }
 0x38d   :  { %v1492_v34 = vsel %vm216_vm2, %v1491_v32, -inf }
 0x397   :  { %310 = vrot.lane.b32.xlu1 %v5038_v40, %s5688_s23 }
 0x3bb   :  { %1493 = vmax.xlane.f32.xlu1 %v1492_v34 }
 0x3cc   :  { %644 = vrot.lane.b32.xlu1 %v5038_v40, %s5686_s28 }
 0x3d0   :  { %811 = vrot.lane.b32.xlu1 %v5038_v40, %s5684_s29 }
 0x3d4   :  { %1002 = vrot.lane.b32.xlu1 %v5052_v41, %s5688_s23  ;;  %s5700_s23 = smov 24  }
 0x3ff   :  { %v301_v37 = vpop.xlane.xlu0 %300 }
 0x400   :  { %v302_v38 = vsub.f32 %v298_v63, %v301_v37  ;;  %v468_v39 = vpop.xlane.xlu1 %467 }
 0x401   :  { %v469_v42 = vsub.f32 %v465_v0, %v468_v39 }
 0x402   :  { %v303_v43 = vmul.f32 1.442695, %v302_v38 }
 0x403   :  { %v470_v44 = vmul.f32 1.442695, %v469_v42 }
 0x404   :  { %4740 = vpow2.f32 %v303_v43 }
 0x405   :  { %4742 = vpow2.f32 %v470_v44 }
 0x407   :  { %v635_v45 = vpop.xlane.xlu0 %634 }
 0x408   :  { %v636_v58 = vsub.f32 %v5119_v6, %v635_v45 }
 0x40a   :  { %v637_v60 = vmul.f32 1.442695, %v636_v58 }
 0x40b   :  { %v802_v46 = vpop.xlane.xlu0 %801 }
 0x40c   :  { %v803_v47 = vsub.f32 %v799_v11, %v802_v46 }
 0x40e   :  { %v4741_v48 = vpop.eup %4740  ;;  %v804_v49 = vmul.f32 1.442695, %v803_v47 }
 0x40f   :  { %v5149_v50 = vpop.eup %4742  ;;  %v305_v51 = vsel %vm216_vm2, %v4741_v48, 0.0  ;;  %v993_v59 = vpop.xlane.xlu0 %992 }
 0x410   :  { %4744 = vpow2.f32 %v804_v49  ;;  %306 = vadd.xlane.f32.xlu0 %v305_v51  ;;  %v472_v52 = vsel %vm216_vm2, %v5149_v50, 0.0  ;;  %v994_v61 = vsub.f32 %v5131_v17, %v993_v59 }
 0x411   :  { %473 = vadd.xlane.f32.xlu1 %v472_v52  ;;  %4746 = vpow2.f32 %v637_v60 }
 0x412   :  { %v995_v63 = vmul.f32 1.442695, %v994_v61 }
 0x413   :  { %v1160_v53 = vpop.xlane.xlu1 %1159 }
 0x414   :  { %4748 = vpow2.f32 %v995_v63  ;;  %v1161_v1 = vsub.f32 %v1157_v22, %v1160_v53 }
 0x416   :  { %v1162_v3 = vmul.f32 1.442695, %v1161_v1 }
 0x417   :  { %v311_v54 = vpop.permute.xlu1 %310  ;;  %v1327_v62 = vpop.xlane.xlu0 %1326 }
 0x418   :  { %4353 = vmatpush3.msra.mxu1 %v311_v54  ;;  %v1328_v0 = vsub.f32 %v1324_v27, %v1327_v62 }
 0x419   :  { %4362 = vmatprep.subr.mxu1 %v4860_v36 }
 0x41a   :  { %v5155_v55 = vpop.eup %4744  ;;  %v1329_v2 = vmul.f32 1.442695, %v1328_v0 }
 0x41b   :  { %v806_v56 = vsel %vm216_vm2, %v5155_v55, 0.0  ;;  %v4747_v4 = vpop.eup %4746 }
 0x41c   :  { %807 = vadd.xlane.f32.xlu1 %v806_v56  ;;  %4750 = vpow2.f32 %v1329_v2 }
 0x41d   :  { %4752 = vpow2.f32 %v1162_v3 }
 0x41e   :  { %v4749_v5 = vpop.eup %4748 }
 0x41f   :  { %v997_v7 = vsel %vm216_vm2, %v4749_v5, 0.0 }
 0x426   :  { %477 = vrot.lane.b32.xlu0 %v5038_v40, %s5682_s30  ;;  %v639_v40 = vsel %vm216_vm2, %v4747_v4, 0.0  ;;  %v5167_v8 = vpop.eup %4750 }
 0x427   :  { %v1331_v11 = vsel %vm216_vm2, %v5167_v8, 0.0  ;;  %v4753_v12 = vpop.eup %4752 }
 0x428   :  { %v1164_v14 = vsel %vm216_vm2, %v4753_v12, 0.0 }
 0x42d   :  { %1169 = vrot.lane.b32.xlu1 %v5052_v41, %s5682_s30 }
 0x445   :  { %640 = vadd.xlane.f32.xlu0 %v639_v40 }
 0x448   :  { %v1494_v6 = vpop.xlane.xlu1 %1493 }
 0x449   :  { %v1495_v9 = vsub.f32 %v1491_v32, %v1494_v6  ;;  %998 = vadd.xlane.f32.xlu0 %v997_v7 }
 0x44b   :  { %v1496_v10 = vmul.f32 1.442695, %v1495_v9 }
 0x44c   :  { %v645_v17 = vpop.permute.xlu1 %644 }
 0x44d   :  { %4754 = vpow2.f32 %v1496_v10  ;;  %1332 = vadd.xlane.f32.xlu0 %v1331_v11 }
 0x450   :  { %v812_v18 = vpop.permute.xlu1 %811 }
 0x451   :  { %1165 = vadd.xlane.f32.xlu1 %v1164_v14 }
 0x454   :  { %v1003_v19 = vpop.permute.xlu1 %1002 }
 0x457   :  { %v5172_v15 = vpop.eup %4754 }
 0x458   :  { %v1498_v16 = vsel %vm216_vm2, %v5172_v15, 0.0 }
 0x459   :  { %1499 = vadd.xlane.f32.xlu0 %v1498_v16 }
 0x462   :  { %1503 = vrot.lane.b32.xlu1 %v5052_v41, %s5684_s29  ;;  %s5715_s29 = sld [smem:[#allocation11_spill]] }
 0x468   :  { %v1594_v56 = vld [vmem:[%s5715_s29] sm:$0xff]  ;;  %v1595_v58 = vld [vmem:[%s5715_s29 + $0x8] sm:$0xff]  ;;  %v1596_v62 = vld [vmem:[%s5715_s29 + $0x10] sm:$0xff] }
 0x469   :  { %v4630_v60 = vpack.c.bf16 %v1595_v58, %v1594_v56  ;;  %v1597_v63 = vld [vmem:[%s5715_s29 + $0x18] sm:$0xff]  ;;  %v4118_v58 = vld [vmem:[%s5662_s8] ss:$0 sm:$0xff] }
 0x46a   :  { %v4634_v1 = vpack.c.bf16 %v1597_v63, %v1596_v62 }
 0x46b   :  { %4631 = vmatprep.subr.bf16.mxu0 %v4630_v60 }
 0x46c   :  { %4633 = vmatpush3.bf16.msra.mxu0 %v4630_v60  ;;  %v4119_v60 = vld [vmem:[%s5663_s9] ss:$0 sm:$0xff] }
 0x46d   :  { %4635 = vmatprep.subr.bf16.mxu0 %v4634_v1 }
 0x46f   :  { %1336 = vrot.lane.b32.xlu0 %v5052_v41, %s5686_s28 }
 0x470   :  { %4637 = vmatpush3.bf16.msra.mxu0 %v4634_v1 }
 0x49d   :  { %v307_v20 = vpop.xlane.xlu0 %306 }
 0x49e   :  { %4756 = vrcp.f32 %v307_v20  ;;  %v474_v21 = vpop.xlane.xlu1 %473 }
 0x49f   :  { %4758 = vrcp.f32 %v474_v21 }
 0x4a1   :  { %v478_v25 = vpop.permute.xlu0 %477 }
 0x4a8   :  { %v4757_v22 = vpop.eup %4756 }
 0x4a9   :  { %v309_v23 = vmul.f32 %v4757_v22, %v4741_v48  ;;  %v4759_v24 = vpop.eup %4758  ;;  %v808_v41 = vpop.xlane.xlu1 %807 }
 0x4aa   :  { %v476_v26 = vmul.f32 %v4759_v24, %v5149_v50 }
 0x4ab   :  { %4355 = vmatmul.mubr.msk.f32.vlgmr.msra.gmra.mrb[2].mxu1 %vm216_vm2, %v309_v23  ;;  %v4115_v23 = vld [vmem:[%s5661_s7] ss:$0 sm:$0xff] }
 0x4ac   :  { %4363 = vmatpush3.msra.mxu1 %v478_v25  ;;  %4364 = vmatprep.mubr.msk.f32.mxu1 %vm4861_vm1, %v4860_v36 }
 0x4ad   :  { %4372 = vmatprep.subr.mxu1 %v4860_v36  ;;  %v1170_v29 = vpop.permute.xlu1 %1169 }
 0x4af   :  { %4365 = vmatmul.mubr.msk.f32.vlgmr.msra.gmra.mrb[4].mxu1 %vm216_vm2, %v476_v26 }
 0x4b0   :  { %4373 = vmatpush3.msra.mxu1 %v645_v17  ;;  %4374 = vmatprep.mubr.msk.f32.mxu1 %vm4861_vm1, %v4860_v36 }
 0x4b1   :  { %4382 = vmatprep.subr.mxu1 %v4860_v36 }
 0x4d2   :  { %v641_v27 = vpop.xlane.xlu0 %640 }
 0x4d3   :  { %4760 = vrcp.f32 %v641_v27 }
 0x4d4   :  { %4762 = vrcp.f32 %v808_v41 }
 0x4d6   :  { %v999_v28 = vpop.xlane.xlu0 %998 }
 0x4d7   :  { %4764 = vrcp.f32 %v999_v28 }
 0x4da   :  { %v1333_v32 = vpop.xlane.xlu0 %1332 }
 0x4dd   :  { %v4761_v30 = vpop.eup %4760 }
 0x4de   :  { %v643_v31 = vmul.f32 %v4761_v30, %v4747_v4  ;;  %v1166_v34 = vpop.xlane.xlu1 %1165  ;;  %v4763_v37 = vpop.eup %4762 }
 0x4df   :  { %4766 = vrcp.f32 %v1166_v34  ;;  %v810_v38 = vmul.f32 %v4763_v37, %v5155_v55 }
 0x4e0   :  { %4375 = vmatmul.mubr.msk.f32.vlgmr.msra.gmra.mrb[6].mxu1 %vm216_vm2, %v643_v31  ;;  %4768 = vrcp.f32 %v1333_v32 }
 0x4e1   :  { %4383 = vmatpush3.msra.mxu1 %v812_v18  ;;  %4384 = vmatprep.mubr.msk.f32.mxu1 %vm4861_vm1, %v4860_v36  ;;  %v4765_v39 = vpop.eup %4764 }
 0x4e2   :  { %4392 = vmatprep.subr.mxu1 %v4860_v36  ;;  %v1001_v42 = vmul.f32 %v4765_v39, %v4749_v5  ;;  %v1504_v49 = vpop.permute.xlu1 %1503 }
 0x4e4   :  { %4385 = vmatmul.mubr.msk.f32.vlgmr.msra.gmra.mrb[8].mxu1 %vm216_vm2, %v810_v38 }
 0x4e5   :  { %4393 = vmatpush3.msra.mxu1 %v1003_v19  ;;  %4394 = vmatprep.mubr.msk.f32.mxu1 %vm4861_vm1, %v4860_v36 }
 0x4e6   :  { %v1500_v43 = vpop.xlane.xlu0 %1499  ;;  %4402 = vmatprep.subr.mxu1 %v4860_v36 }
 0x4e7   :  { %4770 = vrcp.f32 %v1500_v43 }
 0x4e8   :  { %4395 = vmatmul.mubr.msk.f32.vlgmr.msra.gmra.mrb[10].mxu1 %vm216_vm2, %v1001_v42 }
 0x4e9   :  { %v4767_v44 = vpop.eup %4766  ;;  %4403 = vmatpush3.msra.mxu1 %v1170_v29  ;;  %4404 = vmatprep.mubr.msk.f32.mxu1 %vm4861_vm1, %v4860_v36 }
 0x4ea   :  { %v1168_v45 = vmul.f32 %v4767_v44, %v4753_v12  ;;  %v1337_v46 = vpop.permute.xlu0 %1336  ;;  %4412 = vmatprep.subr.mxu1 %v4860_v36  ;;  %v4769_v47 = vpop.eup %4768 }
 0x4eb   :  { %v1335_v48 = vmul.f32 %v4769_v47, %v5167_v8  ;;  %v1734_v47 = vld [vmem:[%s5664_s10 + $0x10] sm:$0xff] }
 0x4ec   :  { %4405 = vmatmul.mubr.msk.f32.vlgmr.msra.gmra.mrb[12].mxu1 %vm216_vm2, %v1168_v45  ;;  %v1733_v45 = vld [vmem:[%s5664_s10 + $0x8] sm:$0xff] }
 0x4ed   :  { %4413 = vmatpush3.msra.mxu1 %v1337_v46  ;;  %4414 = vmatprep.mubr.msk.f32.mxu1 %vm4861_vm1, %v4860_v36 }
 0x4ee   :  { %4422 = vmatprep.subr.mxu1 %v4860_v36 }
 0x4f0   :  { %4415 = vmatmul.mubr.msk.f32.vlgmr.msra.gmra.mrb[14].mxu1 %vm216_vm2, %v1335_v48  ;;  %v1735_v48 = vld [vmem:[%s5664_s10 + $0x18] sm:$0xff] }
 0x4f1   :  { %v4771_v50 = vpop.eup %4770  ;;  %4423 = vmatpush3.msra.mxu1 %v1504_v49  ;;  %4424 = vmatprep.mubr.msk.f32.mxu1 %vm4861_vm1, %v4860_v36  ;;  %v4642_v49 = vpack.c.bf16 %v1735_v48, %v1734_v47 }
 0x4f2   :  { %v1502_v51 = vmul.f32 %v4771_v50, %v5172_v15 }
 0x4f4   :  { %4425 = vmatmul.mubr.msk.f32.vlgmr.msra.gmra.mrb[16].mxu1 %vm216_vm2, %v1502_v51 }
 0x57e   :  { %v382_v52 = vpop.f32.mrb[2].mxu1 }
 0x57f   :  { %v4356_v53 = vpop.f32.mrb[3].mxu1 }
 0x582   :  { %v549_v54 = vpop.f32.mrb[4].mxu1 }
 0x583   :  { %888 = vrot.lane.b32.xlu0 %v549_v54, %s4873_s4  ;;  %v4366_v55 = vpop.f32.mrb[5].mxu1 }
 0x5b3   :  { %v716_v59 = vpop.f32.mrb[6].mxu1 }
 0x5b4   :  { %892 = vrot.lane.b32.xlu1 %v716_v59, %s4874_s3  ;;  %v4376_v61 = vpop.f32.mrb[7].mxu1 }
 0x5b7   :  { %v883_v0 = vpop.f32.mrb[8].mxu1 }
 0x5b8   :  { %896 = vrot.lane.b32.xlu1 %v883_v0, %s5700_s23  ;;  %v4386_v2 = vpop.f32.mrb[9].mxu1 }
 0x5bb   :  { %v1074_v3 = vpop.f32.mrb[10].mxu1 }
 0x5bc   :  { %v4396_v4 = vpop.f32.mrb[11].mxu1 }
 0x5bd   :  { %v1835_v4 = vld [vmem:[%s5666_s12 + $0x8] sm:$0xff] }
 0x5bf   :  { %v1241_v40 = vpop.f32.mrb[12].mxu1 }
 0x5c0   :  { %1580 = vrot.lane.b32.xlu0 %v1241_v40, %s4873_s4  ;;  %v4406_v5 = vpop.f32.mrb[13].mxu1 }
 0x5c1   :  { %v1836_v5 = vld [vmem:[%s5666_s12 + $0x10] sm:$0xff] }
 0x5c3   :  { %v1408_v6 = vpop.f32.mrb[14].mxu1 }
 0x5c4   :  { %1584 = vrot.lane.b32.xlu0 %v1408_v6, %s4874_s3  ;;  %v4416_v7 = vpop.f32.mrb[15].mxu1  ;;  %v1837_v6 = vld [vmem:[%s5666_s12 + $0x18] sm:$0xff] }
 0x5c5   :  { %v4650_v7 = vpack.c.bf16 %v1837_v6, %v1836_v5 }
 0x5c7   :  { %v1575_v8 = vpop.f32.mrb[16].mxu1 }
 0x5c8   :  { %1588 = vrot.lane.b32.xlu1 %v1575_v8, %s5700_s23  ;;  %v4426_v9 = vpop.f32.mrb[17].mxu1  ;;  %v1838_v8 = vld [vmem:[%s5666_s12 + $0x20] sm:$0xff] }
 0x5c9   :  { %v1839_v9 = vld [vmem:[%s5666_s12 + $0x28] sm:$0xff] }
 0x5f5   :  { %v889_v10 = vpop.permute.xlu0 %888 }
 0x5f6   :  { %v899_v12 = vsel %vm216_vm2, %v382_v52, %v889_v10  ;;  %v4654_v10 = vpack.c.bf16 %v1839_v9, %v1838_v8  ;;  %v4133_v9 = vld [vmem:[%s5713_s5 + $0x1] ss:$0 sm:$0xff]  ;;  %s5719_s5 = smov 104  }
 0x626   :  { %v893_v11 = vpop.permute.xlu1 %892 }
 0x627   :  { %v901_v14 = vsel %vm900_vm3, %v899_v12, %v893_v11  ;;  %v1840_v11 = vld [vmem:[%s5666_s12 + $0x30] sm:$0xff]  ;;  %v1841_v12 = vld [vmem:[%s5666_s12 + $0x38] sm:$0xff] }
 0x62a   :  { %v897_v15 = vpop.permute.xlu1 %896 }
 0x62b   :  { %v903_v16 = vsel %vm902_vm4, %v901_v14, %v897_v15  ;;  %v4658_v14 = vpack.c.bf16 %v1841_v12, %v1840_v11  ;;  %v4120_v15 = vld [vmem:[%s5665_s11] ss:$0 sm:$0xff] }
 0x62c   :  { %4435 = vmatprep.mubr.msk.f32.mxu0 %vm76_vm0, %v903_v16 }
 0x632   :  { %v1581_v17 = vpop.permute.xlu0 %1580 }
 0x633   :  { %v1591_v19 = vsel %vm216_vm2, %v1074_v3, %v1581_v17  ;;  %v1834_v3 = vld [vmem:[%s5666_s12] sm:$0xff] }
 0x634   :  { %v4646_v40 = vpack.c.bf16 %v1835_v4, %v1834_v3 }
 0x636   :  { %v1585_v18 = vpop.permute.xlu0 %1584  ;;  %4647 = vmatprep.subr.bf16.mxu0 %v4646_v40 }
 0x637   :  { %v1592_v20 = vsel %vm900_vm3, %v1591_v19, %v1585_v18 }
 0x63a   :  { %v1589_v21 = vpop.permute.xlu1 %1588 }
 0x63b   :  { %v1593_v22 = vsel %vm902_vm4, %v1592_v20, %v1589_v21 }
 0x63c   :  { %4436 = vmatmul.mubr.msk.f32.vlgmr.msra.gmra.mrb[16].mxu0 %vm76_vm0, %v1593_v22 }
 0x63d   :  { %4649 = vmatpush3.bf16.msra.mxu0 %v4646_v40  ;;  %v4127_v40 = vld [vmem:[%s5669_s15] ss:$0 sm:$0xff] }
 0x63e   :  { %4651 = vmatprep.subr.bf16.mxu0 %v4650_v7 }
 0x641   :  { %4653 = vmatpush3.bf16.msra.mxu0 %v4650_v7 }
 0x642   :  { %4655 = vmatprep.subr.bf16.mxu0 %v4654_v10 }
 0x645   :  { %4657 = vmatpush3.bf16.msra.mxu0 %v4654_v10 }
 0x646   :  { %4659 = vmatprep.subr.bf16.mxu0 %v4658_v14 }
 0x649   :  { %4661 = vmatpush3.bf16.msra.mxu0 %v4658_v14 }
 0x64a   :  { %4489 = vmatprep.subr.mxu0 %v4860_v36 }
 0x70f   :  { %v4437_v24 = vpop.f32.mrb[16].mxu0 }
 0x710   :  { %v1683_v25 = vadd.f32 %v4437_v24, %v4115_v23  ;;  %v1677_v26 = vpop.f32.mrb[17].mxu0 }
 0x711   :  { %v1678_v41 = vadd.f32 %v4115_v23, %v1677_v26 }
 0x712   :  { %v1687_v27 = vadd.f32 %v1683_v25, %v5025_v35 }
 0x713   :  { %v1686_v28 = vadd.f32 %v1678_v41, %v5021_v33  ;;  %v1732_v33 = vld [vmem:[%s5664_s10] sm:$0xff] }
 0x714   :  { %v1693_v29 = vsel %vm76_vm0, %v1687_v27, 0.0  ;;  %v4638_v46 = vpack.c.bf16 %v1733_v45, %v1732_v33 }
 0x715   :  { %1694 = vadd.xlane.f32.xlu1 %v1693_v29  ;;  %v1690_v30 = vsel %vm76_vm0, %v1686_v28, 0.0  ;;  %v4123_v29 = vld [vmem:[%s5667_s13] ss:$0 sm:$0xff] }
 0x716   :  { %1691 = vadd.xlane.f32.xlu0 %v1690_v30  ;;  %4639 = vmatprep.subr.bf16.mxu1 %v4638_v46 }
 0x717   :  { %4641 = vmatpush3.bf16.msra.mxu1 %v4638_v46 }
 0x718   :  { %4643 = vmatprep.subr.bf16.mxu1 %v4642_v49 }
 0x71b   :  { %4645 = vmatpush3.bf16.msra.mxu1 %v4642_v49 }
 0x7a2   :  { %v1695_v31 = vpop.xlane.xlu1 %1694 }
 0x7a3   :  { %v1697_v32 = vmul.f32 0.03125, %v1695_v31  ;;  %v1692_v34 = vpop.xlane.xlu0 %1691 }
 0x7a4   :  { %v1696_v37 = vmul.f32 0.03125, %v1692_v34 }
 0x7a5   :  { %v1699_v38 = vsub.f32 %v1687_v27, %v1697_v32 }
 0x7a6   :  { %v1698_v39 = vsub.f32 %v1686_v28, %v1696_v37 }
 0x7a7   :  { %v1701_v44 = vmul.f32 %v1699_v38, %v1699_v38 }
 0x7a8   :  { %v1700_v42 = vmul.f32 %v1698_v39, %v1698_v39 }
 0x7a9   :  { %v1705_v35 = vsel %vm76_vm0, %v1701_v44, 0.0 }
 0x7aa   :  { %v1702_v43 = vsel %vm76_vm0, %v1700_v42, 0.0 }
 0x7ab   :  { %1703 = vadd.xlane.f32.xlu0 %v1702_v43 }
 0x7af   :  { %1706 = vadd.xlane.f32.xlu0 %v1705_v35 }
 0x838   :  { %v1704_v50 = vpop.xlane.xlu0 %1703 }
 0x839   :  { %v1708_v51 = vmul.f32 0.03125, %v1704_v50 }
 0x83b   :  { %v1710_v52 = vadd.f32 1e-12, %v1708_v51  ;;  %v4128_v51 = vld [vmem:[%s5710_s1 + $0x20] sm:$0xff] }
 0x83c   :  { %v1707_v53 = vpop.xlane.xlu0 %1706 }
 0x83d   :  { %4772 = vrsqrt.f32 %v1710_v52  ;;  %v1709_v54 = vmul.f32 0.03125, %v1707_v53  ;;  %v4129_v52 = vld [vmem:[%s5710_s1 + $0x28] sm:$0xff] }
 0x83e   :  { %v4662_v53 = vpack.c.bf16 %v4129_v52, %v4128_v51 }
 0x83f   :  { %v1711_v55 = vadd.f32 1e-12, %v1709_v54  ;;  %v4130_v54 = vld [vmem:[%s5710_s1 + $0x30] sm:$0xff] }
 0x840   :  { %4663 = vmatprep.subr.bf16.mxu1 %v4662_v53 }
 0x841   :  { %4774 = vrsqrt.f32 %v1711_v55  ;;  %v4131_v55 = vld [vmem:[%s5710_s1 + $0x38] sm:$0xff]  ;;  %s5724_s1 = smov 56  }
 0x847   :  { %v4773_v56 = vpop.eup %4772 }
 0x848   :  { %v1714_v59 = vmul.f32 %v4773_v56, %v1698_v39  ;;  %v4666_v56 = vpack.c.bf16 %v4131_v55, %v4130_v54 }
 0x84a   :  { %v1722_v61 = vmul.f32 %v4118_v58, %v1714_v59 }
 0x84b   :  { %v4775_v62 = vpop.eup %4774 }
 0x84c   :  { %v1715_v63 = vmul.f32 %v4775_v62, %v1699_v38  ;;  %v1730_v0 = vadd.f32 %v4119_v60, %v1722_v61 }
 0x84e   :  { %v1723_v1 = vmul.f32 %v4118_v58, %v1715_v63  ;;  %4446 = vmatprep.mubr.msk.f32.mxu1 %vm76_vm0, %v1730_v0 }
 0x850   :  { %v1731_v2 = vadd.f32 %v4119_v60, %v1723_v1  ;;  %v4126_v1 = vld [vmem:[%s5668_s14] ss:$0 sm:$0xff] }
 0x852   :  { %4447 = vmatmul.mubr.msk.f32.vlgmr.msra.gmra.mrb[18].mxu1 %vm76_vm0, %v1731_v2 }
 0x853   :  { %4665 = vmatpush3.bf16.msra.mxu1 %v4662_v53 }
 0x854   :  { %4667 = vmatprep.subr.bf16.mxu1 %v4666_v56 }
 0x857   :  { %4669 = vmatpush3.bf16.msra.mxu1 %v4666_v56 }
 0x858   :  { %4479 = vmatprep.subr.mxu1 %v4860_v36 }
 0x925   :  { %v4448_v16 = vpop.f32.mrb[18].mxu1 }
 0x926   :  { %v1821_v17 = vadd.f32 %v4448_v16, %v4120_v15  ;;  %v1815_v18 = vpop.f32.mrb[19].mxu1 }
 0x927   :  { %v1816_v19 = vadd.f32 %v4120_v15, %v1815_v18 }
 0x928   :  { %v1827_v20 = vmul.f32 0.70710677, %v1821_v17  ;;  %v1825_v41 = vmul.f32 0.5, %v1821_v17 }
 0x929   :  { %v1826_v21 = vmul.f32 0.70710677, %v1816_v19  ;;  %v1824_v25 = vmul.f32 0.5, %v1816_v19 }
 0x92a   :  { %4776 = verf.f32 %v1827_v20 }
 0x92b   :  { %4778 = verf.f32 %v1826_v21 }
 0x934   :  { %v4777_v22 = vpop.eup %4776 }
 0x935   :  { %v4779_v23 = vpop.eup %4778  ;;  %v1831_v24 = vadd.f32 1.0, %v4777_v22 }
 0x936   :  { %v1830_v26 = vadd.f32 1.0, %v4779_v23 }
 0x937   :  { %v1833_v28 = vmul.f32 %v1831_v24, %v1825_v41 }
 0x938   :  { %v1832_v27 = vmul.f32 %v1830_v26, %v1824_v25 }
 0x93a   :  { %4465 = vmatprep.mubr.msk.f32.mxu0 %vm1849_vm5, %v1832_v27 }
 0x93b   :  { %4466 = vmatmul.mubr.msk.f32.vlgmr.msra.gmra.mrb[18].mxu0 %vm1849_vm5, %v1833_v28 }
 0x93c   :  { %4491 = vmatprep.mubr.msk.f32.mxu0 %vm4861_vm1, %v4860_v36 }
 0xa0e   :  { %v4467_v30 = vpop.f32.mrb[18].mxu0 }
 0xa0f   :  { %v1928_v31 = vadd.f32 %v4467_v30, %v4123_v29  ;;  %v1922_v32 = vpop.f32.mrb[19].mxu0 }
 0xa10   :  { %v1923_v34 = vadd.f32 %v4123_v29, %v1922_v32 }
 0xa11   :  { %v1932_v37 = vadd.f32 %v1928_v31, %v1731_v2 }
 0xa12   :  { %v1931_v38 = vadd.f32 %v1923_v34, %v1730_v0 }
 0xa13   :  { %v1938_v39 = vsel %vm76_vm0, %v1932_v37, 0.0 }
 0xa14   :  { %1939 = vadd.xlane.f32.xlu1 %v1938_v39  ;;  %v1935_v42 = vsel %vm76_vm0, %v1931_v38, 0.0 }
 0xa15   :  { %1936 = vadd.xlane.f32.xlu0 %v1935_v42 }
 0xaa1   :  { %v1940_v43 = vpop.xlane.xlu1 %1939 }
 0xaa2   :  { %v1942_v44 = vmul.f32 0.03125, %v1940_v43  ;;  %v1937_v35 = vpop.xlane.xlu0 %1936 }
 0xaa3   :  { %v1941_v33 = vmul.f32 0.03125, %v1937_v35 }
 0xaa4   :  { %v1944_v45 = vsub.f32 %v1932_v37, %v1942_v44 }
 0xaa5   :  { %v1943_v46 = vsub.f32 %v1931_v38, %v1941_v33 }
 0xaa6   :  { %v1946_v47 = vmul.f32 %v1944_v45, %v1944_v45 }
 0xaa7   :  { %v1945_v48 = vmul.f32 %v1943_v46, %v1943_v46 }
 0xaa8   :  { %v1950_v49 = vsel %vm76_vm0, %v1946_v47, 0.0 }
 0xaa9   :  { %1951 = vadd.xlane.f32.xlu1 %v1950_v49  ;;  %v1947_v50 = vsel %vm76_vm0, %v1945_v48, 0.0 }
 0xaaa   :  { %1948 = vadd.xlane.f32.xlu0 %v1947_v50 }
 0xb36   :  { %v1952_v58 = vpop.xlane.xlu1 %1951 }
 0xb37   :  { %v1954_v59 = vmul.f32 0.03125, %v1952_v58  ;;  %v1949_v60 = vpop.xlane.xlu0 %1948 }
 0xb38   :  { %v1953_v61 = vmul.f32 0.03125, %v1949_v60 }
 0xb39   :  { %v1956_v62 = vadd.f32 1e-12, %v1954_v59 }
 0xb3a   :  { %v1955_v63 = vadd.f32 1e-12, %v1953_v61 }
 0xb3b   :  { %4780 = vrsqrt.f32 %v1956_v62 }
 0xb3c   :  { %4782 = vrsqrt.f32 %v1955_v63 }
 0xb45   :  { %v4781_v0 = vpop.eup %4780 }
 0xb46   :  { %v4783_v2 = vpop.eup %4782  ;;  %v1960_v3 = vmul.f32 %v4781_v0, %v1944_v45 }
 0xb47   :  { %v1959_v4 = vmul.f32 %v4783_v2, %v1943_v46 }
 0xb48   :  { %v1968_v5 = vmul.f32 %v4126_v1, %v1960_v3 }
 0xb49   :  { %v1967_v6 = vmul.f32 %v4126_v1, %v1959_v4 }
 0xb4a   :  { %v5327_v8 = vadd.f32 %v4127_v40, %v1968_v5 }
 0xb4b   :  { %v5325_v7 = vadd.f32 %v4127_v40, %v1967_v6 }
 0xb4d   :  { %4476 = vmatprep.mubr.msk.f32.mxu1 %vm76_vm0, %v5325_v7 }
 0xb4e   :  { %4477 = vmatmul.mubr.msk.f32.vlgmr.msra.gmra.mrb[20].mxu1 %vm76_vm0, %v5327_v8 }
 0xb4f   :  { %4481 = vmatprep.mubr.msk.f32.mxu1 %vm4861_vm1, %v4860_v36 }
 0xc21   :  { %v4478_v10 = vpop.f32.mrb[20].mxu1 }
 0xc22   :  { %v2062_v11 = vpop.f32.mrb[21].mxu1  ;;  %v5352_v14 = vadd.f32 %v4478_v10, %v4133_v9 }
 0xc23   :  { %v5338_v12 = vadd.f32 %v4133_v9, %v2062_v11 }
 0xc25   :  { %2239 = vrot.lane.b32.xlu1 %v5338_v12, %s4862_s24  ;;  %2072 = vrot.lane.b32.xlu0 %v5338_v12, %s4863_s6 }
 0xc29   :  { %2237 = vrot.lane.b32.xlu1 %v5338_v12, %s5716_s0  ;;  %2404 = vrot.lane.b32.xlu0 %v5338_v12, %s5717_s25 }
 0xc2d   :  { %2406 = vrot.lane.b32.xlu1 %v5338_v12, %s5718_s26  ;;  %2571 = vrot.lane.b32.xlu0 %v5338_v12, %s5719_s5 }
 0xc31   :  { %2573 = vrot.lane.b32.xlu1 %v5338_v12, %s5720_s2  ;;  %2921 = vrot.lane.b32.xlu0 %v5352_v14, %s4862_s24  ;;  %s5721_s24 = smov 64  }
 0xc35   :  { %2754 = vrot.lane.b32.xlu1 %v5352_v14, %s4863_s6  ;;  %3088 = vrot.lane.b32.xlu0 %v5352_v14, %s5718_s26  ;;  %s5722_s6 = smov 48  }
 0xc39   :  { %2919 = vrot.lane.b32.xlu1 %v5352_v14, %s5716_s0  ;;  %3255 = vrot.lane.b32.xlu0 %v5352_v14, %s5720_s2 }
 0xc3d   :  { %3086 = vrot.lane.b32.xlu1 %v5352_v14, %s5717_s25 }
 0xc41   :  { %3253 = vrot.lane.b32.xlu1 %v5352_v14, %s5719_s5 }
 0xc97   :  { %v2240_v15 = vpop.permute.xlu1 %2239  ;;  %v2073_v16 = vpop.permute.xlu0 %2072 }
 0xc98   :  { %4480 = vmatpush3.xpose.msk.msra.mxu1 %vm216_vm2, %v2073_v16  ;;  %4490 = vmatpush3.xpose.msk.msra.mxu0 %vm216_vm2, %v2240_v15 }
 0xc99   :  { %4499 = vmatprep.subr.mxu0 %v4860_v36  ;;  %4484 = vmatprep.subr.mxu1 %v4860_v36 }
 0xc9b   :  { %v2238_v17 = vpop.permute.xlu1 %2237  ;;  %4482 = vmatmul.mubr.msk.f32.vlgmr.msra.gmra.mrb[22].mxu1 %vm216_vm2, %v5338_v12  ;;  %v2405_v18 = vpop.permute.xlu0 %2404 }
 0xc9c   :  { %4492 = vmatmul.mubr.msk.f32.vlgmr.msra.gmra.mrb[20].mxu0 %vm216_vm2, %v2238_v17  ;;  %4486 = vmatprep.mubr.msk.f32.mxu1 %vm4861_vm1, %v4860_v36 }
 0xc9d   :  { %4501 = vmatprep.mubr.msk.f32.mxu0 %vm4861_vm1, %v4860_v36 }
 0xc9f   :  { %v2407_v19 = vpop.permute.xlu1 %2406  ;;  %v2572_v20 = vpop.permute.xlu0 %2571 }
 0xca0   :  { %4500 = vmatpush3.xpose.msk.msra.mxu0 %vm216_vm2, %v2407_v19 }
 0xca1   :  { %4509 = vmatprep.subr.mxu0 %v4860_v36 }
 0xca3   :  { %v2574_v21 = vpop.permute.xlu1 %2573  ;;  %4502 = vmatmul.mubr.msk.f32.vlgmr.msra.gmra.mrb[22].mxu0 %vm216_vm2, %v2405_v18  ;;  %v2922_v22 = vpop.permute.xlu0 %2921 }
 0xca4   :  { %4510 = vmatpush3.xpose.msk.msra.mxu0 %vm216_vm2, %v2574_v21  ;;  %4511 = vmatprep.mubr.msk.f32.mxu0 %vm4861_vm1, %v4860_v36 }
 0xca5   :  { %4519 = vmatprep.subr.mxu0 %v4860_v36 }
 0xca7   :  { %v2755_v23 = vpop.permute.xlu1 %2754  ;;  %4512 = vmatmul.mubr.msk.f32.vlgmr.msra.gmra.mrb[24].mxu0 %vm216_vm2, %v2572_v20  ;;  %v3089_v25 = vpop.permute.xlu0 %3088 }
 0xca8   :  { %4520 = vmatpush3.xpose.msk.msra.mxu0 %vm216_vm2, %v2755_v23  ;;  %4521 = vmatprep.mubr.msk.f32.mxu0 %vm4861_vm1, %v4860_v36 }
 0xca9   :  { %4529 = vmatprep.subr.mxu0 %v4860_v36 }
 0xcab   :  { %v2920_v24 = vpop.permute.xlu1 %2919  ;;  %4522 = vmatmul.mubr.msk.f32.vlgmr.msra.gmra.mrb[26].mxu0 %vm216_vm2, %v5352_v14  ;;  %v3256_v41 = vpop.permute.xlu0 %3255 }
 0xcac   :  { %4530 = vmatpush3.xpose.msk.msra.mxu0 %vm216_vm2, %v2922_v22  ;;  %4531 = vmatprep.mubr.msk.f32.mxu0 %vm4861_vm1, %v4860_v36 }
 0xcad   :  { %4539 = vmatprep.subr.mxu0 %v4860_v36 }
 0xcaf   :  { %4532 = vmatmul.mubr.msk.f32.vlgmr.msra.gmra.mrb[28].mxu0 %vm216_vm2, %v2920_v24  ;;  %v3087_v26 = vpop.permute.xlu1 %3086 }
 0xcb0   :  { %4540 = vmatpush3.xpose.msk.msra.mxu0 %vm216_vm2, %v3089_v25  ;;  %4541 = vmatprep.mubr.msk.f32.mxu0 %vm4861_vm1, %v4860_v36 }
 0xcb1   :  { %4549 = vmatprep.subr.mxu0 %v4860_v36 }
 0xcb3   :  { %4542 = vmatmul.mubr.msk.f32.vlgmr.msra.gmra.mrb[30].mxu0 %vm216_vm2, %v3087_v26  ;;  %v3254_v27 = vpop.permute.xlu1 %3253 }
 0xcb4   :  { %4550 = vmatpush3.xpose.msk.msra.mxu0 %vm216_vm2, %v3256_v41  ;;  %4551 = vmatprep.mubr.msk.f32.mxu0 %vm4861_vm1, %v4860_v36 }
 0xcb7   :  { %4552 = vmatmul.mubr.msk.f32.vlgmr.msra.gmra.mrb[32].mxu0 %vm216_vm2, %v3254_v27 }
 0xd6e   :  { %v2144_v28 = vpop.f32.mrb[22].mxu1 }
 0xd6f   :  { %v2148_v29 = vmul.f32 0.35355338, %v2144_v28  ;;  %v4483_v30 = vpop.f32.mrb[23].mxu1  ;;  %v2311_v31 = vpop.f32.mrb[20].mxu0 }
 0xd70   :  { %v2315_v32 = vmul.f32 0.35355338, %v2311_v31  ;;  %v4493_v34 = vpop.f32.mrb[21].mxu0 }
 0xd71   :  { %v2149_v37 = vadd.f32 %v5112_v57, %v2148_v29 }
 0xd72   :  { %v2316_v38 = vadd.f32 %v5112_v57, %v2315_v32 }
 0xd73   :  { %v2150_v39 = vsel %vm216_vm2, %v2149_v37, -inf }
 0xd74   :  { %2151 = vmax.xlane.f32.xlu0 %v2150_v39  ;;  %v2317_v42 = vsel %vm216_vm2, %v2316_v38, -inf }
 0xd75   :  { %2318 = vmax.xlane.f32.xlu1 %v2317_v42 }
 0xd76   :  { %v2478_v43 = vpop.f32.mrb[22].mxu0 }
 0xd77   :  { %v2482_v44 = vmul.f32 0.35355338, %v2478_v43  ;;  %v4503_v35 = vpop.f32.mrb[23].mxu0 }
 0xd79   :  { %v5414_v33 = vadd.f32 %v5112_v57, %v2482_v44 }
 0xd7a   :  { %v2645_v45 = vpop.f32.mrb[24].mxu0 }
 0xd7b   :  { %v2649_v46 = vmul.f32 0.35355338, %v2645_v45  ;;  %v4513_v47 = vpop.f32.mrb[25].mxu0  ;;  %v2484_v48 = vsel %vm216_vm2, %v5414_v33, -inf }
 0xd7c   :  { %2485 = vmax.xlane.f32.xlu0 %v2484_v48 }
 0xd7d   :  { %v2650_v49 = vadd.f32 %v5112_v57, %v2649_v46 }
 0xd7e   :  { %v2826_v50 = vpop.f32.mrb[26].mxu0 }
 0xd7f   :  { %v2830_v51 = vmul.f32 0.35355338, %v2826_v50  ;;  %v4523_v52 = vpop.f32.mrb[27].mxu0  ;;  %v2651_v53 = vsel %vm216_vm2, %v2650_v49, -inf }
 0xd80   :  { %2652 = vmax.xlane.f32.xlu0 %v2651_v53 }
 0xd81   :  { %v2831_v54 = vadd.f32 %v5127_v13, %v2830_v51 }
 0xd82   :  { %v2993_v55 = vpop.f32.mrb[28].mxu0 }
 0xd83   :  { %v2997_v56 = vmul.f32 0.35355338, %v2993_v55  ;;  %v4533_v58 = vpop.f32.mrb[29].mxu0  ;;  %v2832_v59 = vsel %vm216_vm2, %v2831_v54, -inf }
 0xd84   :  { %2833 = vmax.xlane.f32.xlu0 %v2832_v59 }
 0xd85   :  { %v2998_v60 = vadd.f32 %v5127_v13, %v2997_v56 }
 0xd86   :  { %v3160_v61 = vpop.f32.mrb[30].mxu0 }
 0xd87   :  { %v3164_v62 = vmul.f32 0.35355338, %v3160_v61  ;;  %v4543_v63 = vpop.f32.mrb[31].mxu0  ;;  %v2999_v57 = vsel %vm216_vm2, %v2998_v60, -inf }
 0xd88   :  { %3000 = vmax.xlane.f32.xlu1 %v2999_v57 }
 0xd89   :  { %v3165_v0 = vadd.f32 %v5127_v13, %v3164_v62 }
 0xd8a   :  { %v3327_v1 = vpop.f32.mrb[32].mxu0 }
 0xd8b   :  { %v4553_v2 = vpop.f32.mrb[33].mxu0  ;;  %v3166_v3 = vsel %vm216_vm2, %v3165_v0, -inf  ;;  %v3331_v4 = vmul.f32 0.35355338, %v3327_v1 }
 0xd8c   :  { %3167 = vmax.xlane.f32.xlu0 %v3166_v3 }
 0xd8d   :  { %v3332_v40 = vadd.f32 %v5127_v13, %v3331_v4 }
 0xd8f   :  { %v3333_v5 = vsel %vm216_vm2, %v3332_v40, -inf }
 0xd99   :  { %2161 = vrot.lane.b32.xlu1 %v5338_v12, %s5721_s24 }
 0xdbd   :  { %3334 = vmax.xlane.f32.xlu1 %v3333_v5 }
 0xdce   :  { %2495 = vrot.lane.b32.xlu1 %v5338_v12, %s5722_s6 }
 0xdd2   :  { %2662 = vrot.lane.b32.xlu1 %v5338_v12, %s5723_s27 }
 0xdd6   :  { %2843 = vrot.lane.b32.xlu1 %v5352_v14, %s5721_s24  ;;  %s5725_s24 = smov 24  }
 0xe01   :  { %v2152_v6 = vpop.xlane.xlu0 %2151 }
 0xe02   :  { %v2153_v9 = vsub.f32 %v2149_v37, %v2152_v6  ;;  %v2319_v10 = vpop.xlane.xlu1 %2318 }
 0xe03   :  { %v2320_v11 = vsub.f32 %v2316_v38, %v2319_v10 }
 0xe04   :  { %v2154_v15 = vmul.f32 1.442695, %v2153_v9 }
 0xe05   :  { %v2321_v16 = vmul.f32 1.442695, %v2320_v11 }
 0xe06   :  { %4784 = vpow2.f32 %v2154_v15 }
 0xe07   :  { %4786 = vpow2.f32 %v2321_v16 }
 0xe09   :  { %v2486_v13 = vpop.xlane.xlu0 %2485 }
 0xe0a   :  { %v2487_v27 = vsub.f32 %v5414_v33, %v2486_v13 }
 0xe0c   :  { %v2488_v29 = vmul.f32 1.442695, %v2487_v27 }
 0xe0d   :  { %v2653_v17 = vpop.xlane.xlu0 %2652 }
 0xe0e   :  { %v2654_v18 = vsub.f32 %v2650_v49, %v2653_v17 }
 0xe10   :  { %v4785_v19 = vpop.eup %4784  ;;  %v2655_v20 = vmul.f32 1.442695, %v2654_v18 }
 0xe11   :  { %v5436_v21 = vpop.eup %4786  ;;  %v2156_v22 = vsel %vm216_vm2, %v4785_v19, 0.0  ;;  %v2834_v28 = vpop.xlane.xlu0 %2833 }
 0xe12   :  { %4788 = vpow2.f32 %v2655_v20  ;;  %2157 = vadd.xlane.f32.xlu0 %v2156_v22  ;;  %v2323_v23 = vsel %vm216_vm2, %v5436_v21, 0.0  ;;  %v2835_v30 = vsub.f32 %v2831_v54, %v2834_v28  ;;  %v4162_v28 = vld [vmem:[%s5715_s29 + $0x30] sm:$0xff] }
 0xe13   :  { %2324 = vadd.xlane.f32.xlu1 %v2323_v23  ;;  %4790 = vpow2.f32 %v2488_v29  ;;  %v4163_v29 = vld [vmem:[%s5715_s29 + $0x38] sm:$0xff] }
 0xe14   :  { %v2836_v32 = vmul.f32 1.442695, %v2835_v30 }
 0xe15   :  { %v3001_v24 = vpop.xlane.xlu1 %3000 }
 0xe16   :  { %4792 = vpow2.f32 %v2836_v32  ;;  %v3002_v37 = vsub.f32 %v2998_v60, %v3001_v24 }
 0xe18   :  { %v3003_v39 = vmul.f32 1.442695, %v3002_v37 }
 0xe19   :  { %v2162_v25 = vpop.permute.xlu1 %2161  ;;  %v3168_v31 = vpop.xlane.xlu0 %3167 }
 0xe1a   :  { %4485 = vmatpush3.msra.mxu1 %v2162_v25  ;;  %v3169_v34 = vsub.f32 %v3165_v0, %v3168_v31  ;;  %v4160_v25 = vld [vmem:[%s5715_s29 + $0x20] sm:$0xff]  ;;  %v4674_v31 = vpack.c.bf16 %v4163_v29, %v4162_v28 }
 0xe1b   :  { %4494 = vmatprep.subr.mxu1 %v4860_v36 }
 0xe1c   :  { %v5442_v26 = vpop.eup %4788  ;;  %v3170_v38 = vmul.f32 1.442695, %v3169_v34 }
 0xe1d   :  { %v2657_v41 = vsel %vm216_vm2, %v5442_v26, 0.0  ;;  %v4791_v42 = vpop.eup %4790 }
 0xe1e   :  { %2658 = vadd.xlane.f32.xlu1 %v2657_v41  ;;  %4794 = vpow2.f32 %v3170_v38 }
 0xe1f   :  { %4796 = vpow2.f32 %v3003_v39 }
 0xe20   :  { %v4793_v43 = vpop.eup %4792 }
 0xe21   :  { %v2838_v35 = vsel %vm216_vm2, %v4793_v43, 0.0 }
 0xe28   :  { %2328 = vrot.lane.b32.xlu0 %v5338_v12, %s5724_s1  ;;  %v2490_v12 = vsel %vm216_vm2, %v4791_v42, 0.0  ;;  %v5453_v33 = vpop.eup %4794 }
 0xe29   :  { %v3172_v47 = vsel %vm216_vm2, %v5453_v33, 0.0  ;;  %v4797_v48 = vpop.eup %4796 }
 0xe2a   :  { %v3005_v49 = vsel %vm216_vm2, %v4797_v48, 0.0 }
 0xe2f   :  { %3010 = vrot.lane.b32.xlu1 %v5352_v14, %s5724_s1 }
 0xe47   :  { %2491 = vadd.xlane.f32.xlu0 %v2490_v12 }
 0xe4a   :  { %v3335_v44 = vpop.xlane.xlu1 %3334 }
 0xe4b   :  { %v3336_v45 = vsub.f32 %v3332_v40, %v3335_v44  ;;  %2839 = vadd.xlane.f32.xlu0 %v2838_v35 }
 0xe4d   :  { %v3337_v46 = vmul.f32 1.442695, %v3336_v45 }
 0xe4e   :  { %v2496_v52 = vpop.permute.xlu1 %2495 }
 0xe4f   :  { %4798 = vpow2.f32 %v3337_v46  ;;  %3173 = vadd.xlane.f32.xlu0 %v3172_v47 }
 0xe52   :  { %v2663_v53 = vpop.permute.xlu1 %2662 }
 0xe53   :  { %3006 = vadd.xlane.f32.xlu1 %v3005_v49 }
 0xe56   :  { %v2844_v54 = vpop.permute.xlu1 %2843 }
 0xe59   :  { %v5458_v50 = vpop.eup %4798 }
 0xe5a   :  { %v3339_v51 = vsel %vm216_vm2, %v5458_v50, 0.0 }
 0xe5b   :  { %3340 = vadd.xlane.f32.xlu0 %v3339_v51 }
 0xe64   :  { %3344 = vrot.lane.b32.xlu1 %v5352_v14, %s5723_s27 }
 0xe71   :  { %3177 = vrot.lane.b32.xlu0 %v5352_v14, %s5722_s6 }
 0xe9f   :  { %v2158_v55 = vpop.xlane.xlu0 %2157 }
 0xea0   :  { %4800 = vrcp.f32 %v2158_v55  ;;  %v2325_v56 = vpop.xlane.xlu1 %2324  ;;  %v4165_v55 = vld [vmem:[%s5661_s7 + $0x1] ss:$0 sm:$0xff] }
 0xea1   :  { %4802 = vrcp.f32 %v2325_v56 }
 0xea3   :  { %v2329_v61 = vpop.permute.xlu0 %2328 }
 0xeaa   :  { %v4801_v58 = vpop.eup %4800 }
 0xeab   :  { %v2160_v59 = vmul.f32 %v4801_v58, %v4785_v19  ;;  %v4803_v60 = vpop.eup %4802  ;;  %v2659_v14 = vpop.xlane.xlu1 %2658 }
 0xeac   :  { %v2327_v62 = vmul.f32 %v4803_v60, %v5436_v21 }
 0xead   :  { %4487 = vmatmul.mubr.msk.f32.vlgmr.msra.gmra.mrb[24].mxu1 %vm216_vm2, %v2160_v59 }
 0xeae   :  { %4495 = vmatpush3.msra.mxu1 %v2329_v61  ;;  %4496 = vmatprep.mubr.msk.f32.mxu1 %vm4861_vm1, %v4860_v36 }
 0xeaf   :  { %4504 = vmatprep.subr.mxu1 %v4860_v36  ;;  %v3011_v0 = vpop.permute.xlu1 %3010 }
 0xeb1   :  { %4497 = vmatmul.mubr.msk.f32.vlgmr.msra.gmra.mrb[26].mxu1 %vm216_vm2, %v2327_v62 }
 0xeb2   :  { %4505 = vmatpush3.msra.mxu1 %v2496_v52  ;;  %4506 = vmatprep.mubr.msk.f32.mxu1 %vm4861_vm1, %v4860_v36 }
 0xeb3   :  { %4514 = vmatprep.subr.mxu1 %v4860_v36 }
 0xed4   :  { %v2492_v63 = vpop.xlane.xlu0 %2491 }
 0xed5   :  { %4804 = vrcp.f32 %v2492_v63 }
 0xed6   :  { %4806 = vrcp.f32 %v2659_v14 }
 0xed8   :  { %v2840_v57 = vpop.xlane.xlu0 %2839 }
 0xed9   :  { %4808 = vrcp.f32 %v2840_v57 }
 0xedc   :  { %v3174_v3 = vpop.xlane.xlu0 %3173 }
 0xedf   :  { %v4805_v1 = vpop.eup %4804 }
 0xee0   :  { %v2494_v2 = vmul.f32 %v4805_v1, %v4791_v42  ;;  %v3007_v4 = vpop.xlane.xlu1 %3006  ;;  %v4807_v40 = vpop.eup %4806 }
 0xee1   :  { %4810 = vrcp.f32 %v3007_v4  ;;  %v2661_v5 = vmul.f32 %v4807_v40, %v5442_v26  ;;  %v4161_v26 = vld [vmem:[%s5715_s29 + $0x28] sm:$0xff] }
 0xee2   :  { %4507 = vmatmul.mubr.msk.f32.vlgmr.msra.gmra.mrb[28].mxu1 %vm216_vm2, %v2494_v2  ;;  %4812 = vrcp.f32 %v3174_v3 }
 0xee3   :  { %4515 = vmatpush3.msra.mxu1 %v2663_v53  ;;  %4516 = vmatprep.mubr.msk.f32.mxu1 %vm4861_vm1, %v4860_v36  ;;  %v4809_v6 = vpop.eup %4808 }
 0xee4   :  { %4524 = vmatprep.subr.mxu1 %v4860_v36  ;;  %v2842_v9 = vmul.f32 %v4809_v6, %v4793_v43  ;;  %v3345_v18 = vpop.permute.xlu1 %3344 }
 0xee6   :  { %4517 = vmatmul.mubr.msk.f32.vlgmr.msra.gmra.mrb[30].mxu1 %vm216_vm2, %v2661_v5 }
 0xee7   :  { %4525 = vmatpush3.msra.mxu1 %v2844_v54  ;;  %4526 = vmatprep.mubr.msk.f32.mxu1 %vm4861_vm1, %v4860_v36 }
 0xee8   :  { %v3341_v10 = vpop.xlane.xlu0 %3340  ;;  %4534 = vmatprep.subr.mxu1 %v4860_v36 }
 0xee9   :  { %4814 = vrcp.f32 %v3341_v10 }
 0xeea   :  { %4527 = vmatmul.mubr.msk.f32.vlgmr.msra.gmra.mrb[32].mxu1 %vm216_vm2, %v2842_v9  ;;  %v4173_v9 = vld [vmem:[%s5664_s10 + $0x28] sm:$0xff] }
 0xeeb   :  { %v4811_v11 = vpop.eup %4810  ;;  %4535 = vmatpush3.msra.mxu1 %v3011_v0  ;;  %4536 = vmatprep.mubr.msk.f32.mxu1 %vm4861_vm1, %v4860_v36 }
 0xeec   :  { %v3009_v15 = vmul.f32 %v4811_v11, %v4797_v48  ;;  %v3178_v16 = vpop.permute.xlu0 %3177  ;;  %4544 = vmatprep.subr.mxu1 %v4860_v36  ;;  %v4813_v13 = vpop.eup %4812  ;;  %v4174_v11 = vld [vmem:[%s5664_s10 + $0x30] sm:$0xff] }
 0xeed   :  { %v3176_v17 = vmul.f32 %v4813_v13, %v5453_v33 }
 0xeee   :  { %4537 = vmatmul.mubr.msk.f32.vlgmr.msra.gmra.mrb[34].mxu1 %vm216_vm2, %v3009_v15  ;;  %v4175_v15 = vld [vmem:[%s5664_s10 + $0x38] sm:$0xff] }
 0xeef   :  { %4545 = vmatpush3.msra.mxu1 %v3178_v16  ;;  %4546 = vmatprep.mubr.msk.f32.mxu1 %vm4861_vm1, %v4860_v36  ;;  %v4682_v16 = vpack.c.bf16 %v4175_v15, %v4174_v11  ;;  %v3827_v15 = vld [vmem:[%s5670_s16] sm:$0xff] }
 0xef0   :  { %4554 = vmatprep.subr.mxu1 %v4860_v36 }
 0xef2   :  { %4547 = vmatmul.mubr.msk.f32.vlgmr.msra.gmra.mrb[36].mxu1 %vm216_vm2, %v3176_v17 }
 0xef3   :  { %v4815_v19 = vpop.eup %4814  ;;  %4555 = vmatpush3.msra.mxu1 %v3345_v18  ;;  %4556 = vmatprep.mubr.msk.f32.mxu1 %vm4861_vm1, %v4860_v36  ;;  %v4670_v36 = vpack.c.bf16 %v4161_v26, %v4160_v25  ;;  %v4171_v25 = vld [vmem:[%s5663_s9 + $0x1] ss:$0 sm:$0xff] }
 0xef4   :  { %v3343_v20 = vmul.f32 %v4815_v19, %v5458_v50 }
 0xef5   :  { %4671 = vmatprep.subr.bf16.mxu0 %v4670_v36 }
 0xef6   :  { %4557 = vmatmul.mubr.msk.f32.vlgmr.msra.gmra.mrb[38].mxu1 %vm216_vm2, %v3343_v20  ;;  %4673 = vmatpush3.bf16.msra.mxu0 %v4670_v36 }
 0xef7   :  { %4675 = vmatprep.subr.bf16.mxu0 %v4674_v31 }
 0xefa   :  { %4677 = vmatpush3.bf16.msra.mxu0 %v4674_v31  ;;  %v4181_v31 = vld [vmem:[%s5666_s12 + $0x48] sm:$0xff] }
 0xf80   :  { %v2233_v21 = vpop.f32.mrb[24].mxu1 }
 0xf81   :  { %v4488_v22 = vpop.f32.mrb[25].mxu1 }
 0xf84   :  { %v2400_v23 = vpop.f32.mrb[26].mxu1 }
 0xf85   :  { %2739 = vrot.lane.b32.xlu0 %v2400_v23, %s4873_s4  ;;  %v4498_v24 = vpop.f32.mrb[27].mxu1  ;;  %v4170_v23 = vld [vmem:[%s5662_s8 + $0x1] ss:$0 sm:$0xff] }
 0xfb5   :  { %v2567_v41 = vpop.f32.mrb[28].mxu1 }
 0xfb6   :  { %2743 = vrot.lane.b32.xlu1 %v2567_v41, %s4874_s3  ;;  %v4508_v27 = vpop.f32.mrb[29].mxu1 }
 0xfb9   :  { %v2734_v30 = vpop.f32.mrb[30].mxu1 }
 0xfba   :  { %2747 = vrot.lane.b32.xlu1 %v2734_v30, %s5725_s24  ;;  %v4518_v32 = vpop.f32.mrb[31].mxu1  ;;  %v4180_v30 = vld [vmem:[%s5666_s12 + $0x40] sm:$0xff] }
 0xfbb   :  { %v4686_v32 = vpack.c.bf16 %v4181_v31, %v4180_v30 }
 0xfbd   :  { %v2915_v34 = vpop.f32.mrb[32].mxu1  ;;  %4687 = vmatprep.subr.bf16.mxu0 %v4686_v32 }
 0xfbe   :  { %v4528_v37 = vpop.f32.mrb[33].mxu1 }
 0xfbf   :  { %v4183_v37 = vld [vmem:[%s5666_s12 + $0x58] sm:$0xff] }
 0xfc1   :  { %v3082_v38 = vpop.f32.mrb[34].mxu1 }
 0xfc2   :  { %3421 = vrot.lane.b32.xlu0 %v3082_v38, %s4873_s4  ;;  %v4538_v39 = vpop.f32.mrb[35].mxu1 }
 0xfc3   :  { %v4184_v39 = vld [vmem:[%s5666_s12 + $0x60] sm:$0xff] }
 0xfc5   :  { %v3249_v42 = vpop.f32.mrb[36].mxu1 }
 0xfc6   :  { %3425 = vrot.lane.b32.xlu0 %v3249_v42, %s4874_s3  ;;  %v4548_v12 = vpop.f32.mrb[37].mxu1  ;;  %v4185_v42 = vld [vmem:[%s5666_s12 + $0x68] sm:$0xff] }
 0xfc7   :  { %v4694_v12 = vpack.c.bf16 %v4185_v42, %v4184_v39  ;;  %v3931_v42 = vld [vmem:[%s5672_s18 + $0x10] sm:$0xff] }
 0xfc9   :  { %v3416_v43 = vpop.f32.mrb[38].mxu1 }
 0xfca   :  { %3429 = vrot.lane.b32.xlu1 %v3416_v43, %s5725_s24  ;;  %v4558_v44 = vpop.f32.mrb[39].mxu1  ;;  %v4186_v43 = vld [vmem:[%s5666_s12 + $0x70] sm:$0xff] }
 0xfcb   :  { %v4187_v44 = vld [vmem:[%s5666_s12 + $0x78] sm:$0xff] }
 0xff7   :  { %v2740_v35 = vpop.permute.xlu0 %2739 }
 0xff8   :  { %v2750_v45 = vsel %vm216_vm2, %v2233_v21, %v2740_v35  ;;  %v4698_v35 = vpack.c.bf16 %v4187_v44, %v4186_v43  ;;  %v4196_v44 = vld [vmem:[%s5671_s17] ss:$0 sm:$0xff] }
0x1028   :  { %v2744_v33 = vpop.permute.xlu1 %2743 }
0x1029   :  { %v2751_v46 = vsel %vm900_vm3, %v2750_v45, %v2744_v33  ;;  %v4177_v33 = vld [vmem:[%s5665_s11 + $0x1] ss:$0 sm:$0xff] }
0x102c   :  { %v2748_v47 = vpop.permute.xlu1 %2747 }
0x102d   :  { %v2752_v48 = vsel %vm902_vm4, %v2751_v46, %v2748_v47 }
0x102e   :  { %4567 = vmatprep.mubr.msk.f32.mxu0 %vm76_vm0, %v2752_v48 }
0x1034   :  { %v3422_v49 = vpop.permute.xlu0 %3421 }
0x1035   :  { %v3432_v51 = vsel %vm216_vm2, %v2915_v34, %v3422_v49  ;;  %v4182_v34 = vld [vmem:[%s5666_s12 + $0x50] sm:$0xff] }
0x1036   :  { %v4690_v38 = vpack.c.bf16 %v4183_v37, %v4182_v34  ;;  %v3929_v37 = vld [vmem:[%s5672_s18] sm:$0xff] }
0x1038   :  { %v3426_v50 = vpop.permute.xlu0 %3425 }
0x1039   :  { %v3433_v52 = vsel %vm900_vm3, %v3432_v51, %v3426_v50 }
0x103c   :  { %v3430_v53 = vpop.permute.xlu1 %3429 }
0x103d   :  { %v3434_v54 = vsel %vm902_vm4, %v3433_v52, %v3430_v53 }
0x103e   :  { %4568 = vmatmul.mubr.msk.f32.vlgmr.msra.gmra.mrb[34].mxu0 %vm76_vm0, %v3434_v54 }
0x103f   :  { %4689 = vmatpush3.bf16.msra.mxu0 %v4686_v32 }
0x1040   :  { %4691 = vmatprep.subr.bf16.mxu0 %v4690_v38 }
0x1043   :  { %4693 = vmatpush3.bf16.msra.mxu0 %v4690_v38  ;;  %v3930_v38 = vld [vmem:[%s5672_s18 + $0x8] sm:$0xff] }
0x1044   :  { %4695 = vmatprep.subr.bf16.mxu0 %v4694_v12  ;;  %v4710_v39 = vpack.c.bf16 %v3930_v38, %v3929_v37 }
0x1047   :  { %4697 = vmatpush3.bf16.msra.mxu0 %v4694_v12  ;;  %v3932_v12 = vld [vmem:[%s5672_s18 + $0x18] sm:$0xff] }
0x1048   :  { %4699 = vmatprep.subr.bf16.mxu0 %v4698_v35  ;;  %v4714_v43 = vpack.c.bf16 %v3932_v12, %v3931_v42 }
0x104b   :  { %4701 = vmatpush3.bf16.msra.mxu0 %v4698_v35 }
0x1111   :  { %v4569_v56 = vpop.f32.mrb[34].mxu0 }
0x1112   :  { %v3526_v58 = vadd.f32 %v4569_v56, %v4165_v55  ;;  %v3520_v59 = vpop.f32.mrb[35].mxu0 }
0x1113   :  { %v3521_v60 = vadd.f32 %v4165_v55, %v3520_v59 }
0x1114   :  { %v3530_v61 = vadd.f32 %v3526_v58, %v5327_v8 }
0x1115   :  { %v3529_v62 = vadd.f32 %v3521_v60, %v5325_v7  ;;  %v4172_v7 = vld [vmem:[%s5664_s10 + $0x20] sm:$0xff]  ;;  %s4876_s10 = smov [#allocation2]  }
0x1116   :  { %v3538_v14 = vsel %vm76_vm0, %v3530_v61, 0.0  ;;  %v4678_v10 = vpack.c.bf16 %v4173_v9, %v4172_v7  ;;  %v4189_v60 = vld [vmem:[%s5667_s13 + $0x1] ss:$0 sm:$0xff]  ;;  %s4072_s24 = sshll.u32 %s4876_s10, 4  ;;  %s4073_s24 = int_to_ptr.vmem [resolvable:$true] %s4072_s24 }
0x1117   :  { %3539 = vadd.xlane.f32.xlu1 %v3538_v14  ;;  %v3535_v63 = vsel %vm76_vm0, %v3529_v62, 0.0  ;;  %s4836_s8 = scalar_lea.vmem %s4073_s24, 256  ;;  %p4841_p1 = scmp.lt.s32.totalorder %s4073_s24, %s4073_s24 }
0x1118   :  { %3536 = vadd.xlane.f32.xlu0 %v3535_v63  ;;  %4679 = vmatprep.subr.bf16.mxu1 %v4678_v10  ;;  %p4837_p0 = scmp.ne.s32.totalorder %s4073_s24, %s4836_s8  ;;  %p4842_p2 = scmp.lt.s32.totalorder %s4836_s8, %s4836_s8 }
0x1119   :  { %4681 = vmatpush3.bf16.msra.mxu1 %v4678_v10 }
0x111a   :  { %4683 = vmatprep.subr.bf16.mxu1 %v4682_v16  ;;  %p4843_p3 = por %p4842_p2, %p4841_p1 }
0x111c   :  { %p4844_p4 = pnand %p4843_p3, %p4837_p0 }
0x111d   :  { %4685 = vmatpush3.bf16.msra.mxu1 %v4682_v16  ;;  %v3828_v16 = vld [vmem:[%s5670_s16 + $0x8] sm:$0xff] }
0x11a4   :  { %v3540_v57 = vpop.xlane.xlu1 %3539 }
0x11a5   :  { %v3542_v0 = vmul.f32 0.03125, %v3540_v57  ;;  %v3537_v1 = vpop.xlane.xlu0 %3536 }
0x11a6   :  { %v3541_v2 = vmul.f32 0.03125, %v3537_v1 }
0x11a7   :  { %v3544_v3 = vsub.f32 %v3530_v61, %v3542_v0 }
0x11a8   :  { %v3543_v4 = vsub.f32 %v3529_v62, %v3541_v2 }
0x11a9   :  { %v3546_v6 = vmul.f32 %v3544_v3, %v3544_v3 }
0x11aa   :  { %v3545_v40 = vmul.f32 %v3543_v4, %v3543_v4 }
0x11ab   :  { %v3550_v8 = vsel %vm76_vm0, %v3546_v6, 0.0 }
0x11ac   :  { %v3547_v5 = vsel %vm76_vm0, %v3545_v40, 0.0 }
0x11ad   :  { %3548 = vadd.xlane.f32.xlu0 %v3547_v5 }
0x11b1   :  { %3551 = vadd.xlane.f32.xlu0 %v3550_v8 }
0x123a   :  { %v3549_v13 = vpop.xlane.xlu0 %3548 }
0x123b   :  { %v3553_v17 = vmul.f32 0.03125, %v3549_v13  ;;  %v4702_v13 = vpack.c.bf16 %v3828_v16, %v3827_v15 }
0x123d   :  { %v3555_v18 = vadd.f32 1e-12, %v3553_v17  ;;  %v3829_v17 = vld [vmem:[%s5670_s16 + $0x10] sm:$0xff]  ;;  %4703 = vmatprep.subr.bf16.mxu1 %v4702_v13 }
0x123e   :  { %v3552_v19 = vpop.xlane.xlu0 %3551 }
0x123f   :  { %4816 = vrsqrt.f32 %v3555_v18  ;;  %v3554_v20 = vmul.f32 0.03125, %v3552_v19  ;;  %v3830_v18 = vld [vmem:[%s5670_s16 + $0x18] sm:$0xff] }
0x1240   :  { %v4706_v19 = vpack.c.bf16 %v3830_v18, %v3829_v17  ;;  %v4202_v17 = vld [vmem:[%s5674_s20] ss:$0 sm:$0xff] }
0x1241   :  { %v3556_v21 = vadd.f32 1e-12, %v3554_v20 }
0x1243   :  { %4818 = vrsqrt.f32 %v3556_v21 }
0x1249   :  { %v4817_v22 = vpop.eup %4816 }
0x124a   :  { %v3559_v24 = vmul.f32 %v4817_v22, %v3543_v4 }
0x124c   :  { %v3567_v26 = vmul.f32 %v4170_v23, %v3559_v24 }
0x124d   :  { %v4819_v41 = vpop.eup %4818 }
0x124e   :  { %v3560_v36 = vmul.f32 %v4819_v41, %v3544_v3  ;;  %v3575_v27 = vadd.f32 %v4171_v25, %v3567_v26  ;;  %v4194_v41 = vld [vmem:[%s5668_s14 + $0x1] ss:$0 sm:$0xff] }
0x1250   :  { %v3568_v28 = vmul.f32 %v4170_v23, %v3560_v36  ;;  %4578 = vmatprep.mubr.msk.f32.mxu1 %vm76_vm0, %v3575_v27 }
0x1252   :  { %v3576_v29 = vadd.f32 %v4171_v25, %v3568_v28 }
0x1254   :  { %4579 = vmatmul.mubr.msk.f32.vlgmr.msra.gmra.mrb[40].mxu1 %vm76_vm0, %v3576_v29 }
0x1255   :  { %4705 = vmatpush3.bf16.msra.mxu1 %v4702_v13 }
0x1256   :  { %4707 = vmatprep.subr.bf16.mxu1 %v4706_v19 }
0x1259   :  { %4709 = vmatpush3.bf16.msra.mxu1 %v4706_v19 }
0x125a   :  { %4711 = vmatprep.subr.bf16.mxu1 %v4710_v39 }
0x1327   :  { %v4580_v45 = vpop.f32.mrb[40].mxu1 }
0x1328   :  { %v3668_v46 = vadd.f32 %v4580_v45, %v4177_v33  ;;  %v3662_v47 = vpop.f32.mrb[41].mxu1 }
0x1329   :  { %v3663_v48 = vadd.f32 %v4177_v33, %v3662_v47 }
0x132a   :  { %v3674_v49 = vmul.f32 0.70710677, %v3668_v46  ;;  %v3672_v56 = vmul.f32 0.5, %v3668_v46 }
0x132b   :  { %v3673_v50 = vmul.f32 0.70710677, %v3663_v48  ;;  %v3671_v54 = vmul.f32 0.5, %v3663_v48 }
0x132c   :  { %4820 = verf.f32 %v3674_v49 }
0x132d   :  { %4822 = verf.f32 %v3673_v50 }
0x1336   :  { %v4821_v51 = vpop.eup %4820 }
0x1337   :  { %v4823_v52 = vpop.eup %4822  ;;  %v3678_v53 = vadd.f32 1.0, %v4821_v51 }
0x1338   :  { %v3677_v55 = vadd.f32 1.0, %v4823_v52 }
0x1339   :  { %v3680_v59 = vmul.f32 %v3678_v53, %v3672_v56 }
0x133a   :  { %v3679_v58 = vmul.f32 %v3677_v55, %v3671_v54 }
0x133c   :  { %4597 = vmatprep.mubr.msk.f32.mxu0 %vm1849_vm5, %v3679_v58  ;;  %v4199_v58 = vld [vmem:[%s5673_s19] ss:$0 sm:$0xff] }
0x133d   :  { %4598 = vmatmul.mubr.msk.f32.vlgmr.msra.gmra.mrb[36].mxu0 %vm1849_vm5, %v3680_v59 }
0x1410   :  { %v4599_v61 = vpop.f32.mrb[36].mxu0 }
0x1411   :  { %v3776_v62 = vadd.f32 %v4599_v61, %v4189_v60  ;;  %v3770_v14 = vpop.f32.mrb[37].mxu0 }
0x1412   :  { %v3771_v63 = vadd.f32 %v4189_v60, %v3770_v14 }
0x1413   :  { %v3780_v57 = vadd.f32 %v3776_v62, %v3576_v29  ;;  %v4195_v29 = vld [vmem:[%s5669_s15 + $0x1] ss:$0 sm:$0xff] }
0x1414   :  { %v3779_v0 = vadd.f32 %v3771_v63, %v3575_v27 }
0x1415   :  { %v3788_v1 = vsel %vm76_vm0, %v3780_v57, 0.0 }
0x1416   :  { %3789 = vadd.xlane.f32.xlu1 %v3788_v1  ;;  %v3785_v2 = vsel %vm76_vm0, %v3779_v0, 0.0 }
0x1417   :  { %3786 = vadd.xlane.f32.xlu0 %v3785_v2 }
0x14a3   :  { %v3790_v3 = vpop.xlane.xlu1 %3789 }
0x14a4   :  { %v3792_v4 = vmul.f32 0.03125, %v3790_v3  ;;  %v3787_v40 = vpop.xlane.xlu0 %3786 }
0x14a5   :  { %v3791_v5 = vmul.f32 0.03125, %v3787_v40 }
0x14a6   :  { %v3794_v6 = vsub.f32 %v3780_v57, %v3792_v4 }
0x14a7   :  { %v3793_v8 = vsub.f32 %v3779_v0, %v3791_v5 }
0x14a8   :  { %v3796_v7 = vmul.f32 %v3794_v6, %v3794_v6 }
0x14a9   :  { %v3795_v9 = vmul.f32 %v3793_v8, %v3793_v8 }
0x14aa   :  { %v3800_v10 = vsel %vm76_vm0, %v3796_v7, 0.0 }
0x14ab   :  { %3801 = vadd.xlane.f32.xlu1 %v3800_v10  ;;  %v3797_v11 = vsel %vm76_vm0, %v3795_v9, 0.0 }
0x14ac   :  { %3798 = vadd.xlane.f32.xlu0 %v3797_v11 }
0x1538   :  { %v3802_v20 = vpop.xlane.xlu1 %3801 }
0x1539   :  { %v3804_v21 = vmul.f32 0.03125, %v3802_v20  ;;  %v3799_v22 = vpop.xlane.xlu0 %3798 }
0x153a   :  { %v3803_v23 = vmul.f32 0.03125, %v3799_v22 }
0x153b   :  { %v3806_v24 = vadd.f32 1e-12, %v3804_v21  ;;  %v4203_v21 = vld [vmem:[%s5675_s21] ss:$0 sm:$0xff] }
0x153c   :  { %v3805_v25 = vadd.f32 1e-12, %v3803_v23 }
0x153d   :  { %4824 = vrsqrt.f32 %v3806_v24 }
0x153e   :  { %4826 = vrsqrt.f32 %v3805_v25 }
0x1547   :  { %v4825_v26 = vpop.eup %4824 }
0x1548   :  { %v4827_v36 = vpop.eup %4826  ;;  %v3810_v27 = vmul.f32 %v4825_v26, %v3794_v6 }
0x1549   :  { %v3809_v28 = vmul.f32 %v4827_v36, %v3793_v8 }
0x154a   :  { %v3818_v30 = vmul.f32 %v4194_v41, %v3810_v27 }
0x154b   :  { %v3817_v31 = vmul.f32 %v4194_v41, %v3809_v28 }
0x154c   :  { %v3826_v34 = vadd.f32 %v4195_v29, %v3818_v30 }
0x154d   :  { %v3825_v32 = vadd.f32 %v4195_v29, %v3817_v31 }
0x154f   :  { %4608 = vmatprep.mubr.msk.f32.mxu1 %vm76_vm0, %v3825_v32 }
0x1550   :  { %4609 = vmatmul.mubr.msk.f32.vlgmr.msra.gmra.mrb[42].mxu1 %vm76_vm0, %v3826_v34 }
0x1551   :  { %4713 = vmatpush3.bf16.msra.mxu1 %v4710_v39 }
0x1552   :  { %4715 = vmatprep.subr.bf16.mxu1 %v4714_v43 }
0x1555   :  { %4717 = vmatpush3.bf16.msra.mxu1 %v4714_v43 }
0x1623   :  { %v4610_v35 = vpop.f32.mrb[42].mxu1 }
0x1624   :  { %v3916_v33 = vadd.f32 %v4610_v35, %v4196_v44  ;;  %v3910_v45 = vpop.f32.mrb[43].mxu1 }
0x1625   :  { %v3911_v46 = vadd.f32 %v4196_v44, %v3910_v45 }
0x1626   :  { %v3922_v47 = vmul.f32 0.70710677, %v3916_v33  ;;  %v3920_v54 = vmul.f32 0.5, %v3916_v33 }
0x1627   :  { %v3921_v48 = vmul.f32 0.70710677, %v3911_v46  ;;  %v3919_v52 = vmul.f32 0.5, %v3911_v46 }
0x1628   :  { %4828 = verf.f32 %v3922_v47 }
0x1629   :  { %4830 = verf.f32 %v3921_v48 }
0x1632   :  { %v4829_v49 = vpop.eup %4828 }
0x1633   :  { %v4831_v50 = vpop.eup %4830  ;;  %v3926_v51 = vadd.f32 1.0, %v4829_v49 }
0x1634   :  { %v3925_v53 = vadd.f32 1.0, %v4831_v50 }
0x1635   :  { %v3928_v56 = vmul.f32 %v3926_v51, %v3920_v54 }
0x1636   :  { %v3927_v55 = vmul.f32 %v3925_v53, %v3919_v52 }
0x1638   :  { %4619 = vmatprep.mubr.msk.f32.mxu1 %vm76_vm0, %v3927_v55 }
0x1639   :  { %4620 = vmatmul.mubr.msk.f32.vlgmr.msra.gmra.mrb[44].mxu1 %vm76_vm0, %v3928_v56 }
0x170c   :  { %v4621_v59 = vpop.f32.mrb[44].mxu1 }
0x170d   :  { %v4018_v60 = vadd.f32 %v4621_v59, %v4199_v58  ;;  %v4012_v61 = vpop.f32.mrb[45].mxu1 }
0x170e   :  { %v4013_v62 = vadd.f32 %v4199_v58, %v4012_v61 }
0x170f   :  { %v4026_v14 = vsel %vm76_vm0, %v4018_v60, 0.0 }
0x1710   :  { %4027 = vadd.xlane.f32.xlu1 %v4026_v14  ;;  %v4023_v63 = vsel %vm76_vm0, %v4013_v62, 0.0 }
0x1711   :  { %4024 = vadd.xlane.f32.xlu0 %v4023_v63 }
0x179d   :  { %v4028_v57 = vpop.xlane.xlu1 %4027 }
0x179e   :  { %v4030_v0 = vmul.f32 0.03125, %v4028_v57  ;;  %v4025_v1 = vpop.xlane.xlu0 %4024 }
0x179f   :  { %v4029_v2 = vmul.f32 0.03125, %v4025_v1 }
0x17a0   :  { %v4032_v3 = vsub.f32 %v4018_v60, %v4030_v0 }
0x17a1   :  { %v4031_v4 = vsub.f32 %v4013_v62, %v4029_v2 }
0x17a2   :  { %v4034_v40 = vmul.f32 %v4032_v3, %v4032_v3 }
0x17a3   :  { %v4033_v5 = vmul.f32 %v4031_v4, %v4031_v4 }
0x17a4   :  { %v4038_v6 = vsel %vm76_vm0, %v4034_v40, 0.0 }
0x17a5   :  { %4039 = vadd.xlane.f32.xlu1 %v4038_v6  ;;  %v4035_v8 = vsel %vm76_vm0, %v4033_v5, 0.0 }
0x17a6   :  { %4036 = vadd.xlane.f32.xlu0 %v4035_v8 }
0x1832   :  { %v4040_v7 = vpop.xlane.xlu1 %4039 }
0x1833   :  { %v4042_v9 = vmul.f32 0.03125, %v4040_v7  ;;  %v4037_v10 = vpop.xlane.xlu0 %4036 }
0x1834   :  { %v4041_v11 = vmul.f32 0.03125, %v4037_v10 }
0x1835   :  { %v4044_v15 = vadd.f32 1e-05, %v4042_v9 }
0x1836   :  { %v4043_v16 = vadd.f32 1e-05, %v4041_v11 }
0x1837   :  { %4832 = vrsqrt.f32 %v4044_v15 }
0x1838   :  { %4834 = vrsqrt.f32 %v4043_v16 }
0x1841   :  { %v4833_v13 = vpop.eup %4832 }
0x1842   :  { %v4835_v18 = vpop.eup %4834  ;;  %v4048_v19 = vmul.f32 %v4833_v13, %v4032_v3 }
0x1843   :  { %v4047_v20 = vmul.f32 %v4835_v18, %v4031_v4 }
0x1844   :  { %v4056_v22 = vmul.f32 %v4202_v17, %v4048_v19 }
0x1845   :  { %v4055_v23 = vmul.f32 %v4202_v17, %v4047_v20 }
0x1846   :  { %v4064_v24 = vadd.f32 %v4203_v21, %v4056_v22 }
0x1847   :  { %v4063_v25 = vadd.f32 %v4203_v21, %v4055_v23 }
0x1848   :  { %4066 = vst.msk [vmem:[#allocation2 + $0x8] sm:$0xff] %vm76_vm0, %v4064_v24 }
0x1849   :  { %4065 = vst.msk [vmem:[#allocation2] sm:$0xff] %vm76_vm0, %v4063_v25 }
0x184a   :  { %4847 = shalt.err (!%p4844_p4)
}
0x184b   :  { %s4848_s3 = scalar_lea.hbm %s5676_s22, 256 }
0x184c   :  { %p4849_p5 = scmp.ne.s32.totalorder %s5676_s22, %s4848_s3  ;;  %p4852_p6 = scmp.lt.u32.totalorder %s4848_s3, %s5676_s22 }
0x184e   :  { %p4854_p7 = pnand %p4852_p6, %p4849_p5 }
0x1850   :  { %4857 = shalt.err (!%p4854_p7)
}
0x1851   :  { %s4877_s27 = smov 128  }
0x1852   :  { %4078 = dma.vmem_to_hbm [thread:$0]  %s4073_s24, 256, %s5676_s22, [#allocation3], %s4877_s27, %s4877_s27, %s4873_s4  }
0x1853   :  { %4858 = dma.done.wait [#allocation3], 256  }
0x1854   :  { %4859 = vsyncadd [#allocation3], 4294967040 }
0x1855   :  { %4082 = vsyncpa [#allocation3], 1 }

</bundles_post_ra>
